<compile_context>
chip_gen: v7x
topology: tpu7x:2x2x1
jax: 0.10.0
libtpu: 0.0.40
codegen_flags: <defaults>
</compile_context>

<pallas_src>
import numpy as np
import jax
import jax.numpy as jnp
from jax.experimental import pallas as pl
from jax.experimental.pallas import tpu as pltpu

# ----------------------------- configuration --------------------------------
NUM_LEVELS = 4
FEATURE_DIMS = [8, 16, 24, 32]            # intermediate_features_dim
SPATIAL = [(16, 16), (8, 8), (4, 4), (2, 2)]
C_INT = 32                                # params.intermediate_channels
NUM_CLASSES = 5
LABEL_SIZE = (32, 32)                     # params.resize_output
BN_EPS = 1e-5
BATCH = 2


# ----------------------- bilinear resize as a matrix -------------------------
def _resize_matrix_1d(out_size, in_size):
    """PyTorch F.interpolate(mode='bilinear', align_corners=False) weights."""
    m = np.zeros((out_size, in_size), dtype=np.float32)
    scale = in_size / out_size
    for o in range(out_size):
        src = (o + 0.5) * scale - 0.5
        src = max(src, 0.0)
        i0 = min(int(np.floor(src)), in_size - 1)
        frac = src - i0
        i1 = min(i0 + 1, in_size - 1)
        m[o, i0] += 1.0 - frac
        m[o, i1] += frac
    return m


def _resize_matrix_2d(out_hw, in_hw):
    ry = _resize_matrix_1d(out_hw[0], in_hw[0])   # [Hout, Hin]
    rx = _resize_matrix_1d(out_hw[1], in_hw[1])   # [Wout, Win]
    # flattened-spatial operator: out[ho*Wout+wo, hi*Win+wi] = ry[ho,hi]*rx[wo,wi]
    return np.kron(ry, rx).astype(np.float32)     # [Hout*Wout, Hin*Win]


# ------------------------------- Pallas kernel -------------------------------
def _decoder_kernel(x0, x1, x2, x3,            # [1, C_i, HW_i]       bf16
                    r1, r2, r3,                # [HW_i, HW0]          bf16 (level 0 = identity, skipped)
                    w0, b0, w1, b1, w2, b2, w3, b3,   # [C_int, C_i] bf16 / [C_int, 1] f32
                    cf0, cf1, cf2, cf3,        # [NC, C_int]          bf16 (classifier fused into fuse slice)
                    bias_tot,                  # [NC, 1]              f32  (Wc @ b_fuse + b_cls)
                    rout,                      # [HW0, HW_label]      bf16 (final resize, transposed)
                    out_ref):                  # [1, NC, HW_label]    f32
    xs = (x0, x1, x2, x3)
    rs = (None, r1, r2, r3)
    ws = (w0, w1, w2, w3)
    bs = (b0, b1, b2, b3)
    cfs = (cf0, cf1, cf2, cf3)

    acc = None
    for i in range(NUM_LEVELS):
        xt = xs[i][0]                                                    # [C_i, HW_i]
        h = jnp.dot(ws[i][...], xt, preferred_element_type=jnp.float32) + bs[i][...]
        h = jnp.maximum(h, 0.0).astype(jnp.bfloat16)                     # conv1x1 + BN + ReLU
        # fuse+classifier first (tiny K), then resize with only NC rows
        p = jnp.dot(cfs[i][...], h, preferred_element_type=jnp.float32)  # [NC, HW_i]
        if rs[i] is not None:
            p = jnp.dot(p.astype(jnp.bfloat16), rs[i][...],
                        preferred_element_type=jnp.float32)              # [NC, HW0]
        acc = p if acc is None else acc + p

    # TODO(synk): nn.Dropout is identity in eval mode; classifier_dropout_prob intentionally unused.
    logits = (acc + bias_tot[...]).astype(jnp.bfloat16)                  # [NC, HW0]
    out_ref[0] = jnp.dot(logits, rout[...],
                         preferred_element_type=jnp.float32)             # [NC, HW_label]


# ------------------------------- wrapper -------------------------------------
def all_mlp_decoder_pallas(xs_cf, rT_list, wT_list, b_list, cf_list, bias_tot, routT):
    """xs_cf: list of [B, C_i, H_i*W_i] channels-first slabs (f32, cast to bf16 here).

    Returns (B, NUM_CLASSES, H_label*W_label) f32 — already NCHW-ordered; a plain
    reshape yields (B, NUM_CLASSES, H_label, W_label)."""
    B = xs_cf[0].shape[0]
    hw_out = routT.shape[1]
    nclass = cf_list[0].shape[0]

    in_specs, args = [], []

    def add_const(arr):
        in_specs.append(pl.BlockSpec(arr.shape, lambda b: (0, 0)))
        args.append(arr)

    # per-batch channels-first feature slabs (bf16 MXU operands)
    for x in xs_cf:
        xb = x.astype(jnp.bfloat16)
        in_specs.append(pl.BlockSpec((1,) + xb.shape[1:], lambda b: (b, 0, 0)))
        args.append(xb)
    # non-identity transposed resize operators (levels 1..3)
    for r in rT_list[1:]:
        add_const(r.astype(jnp.bfloat16))
    # per-level folded conv+BN params (transposed weight, column bias)
    for w, bias in zip(wT_list, b_list):
        add_const(w.astype(jnp.bfloat16))
        add_const(bias.astype(jnp.float32))
    # classifier-fused fuse slices (reversed-concat handled host-side), fused bias, final resize
    for cf in cf_list:
        add_const(cf.astype(jnp.bfloat16))
    add_const(bias_tot.astype(jnp.float32))
    add_const(routT.astype(jnp.bfloat16))

    out_spec = pl.BlockSpec((1, nclass, hw_out), lambda b: (b, 0, 0))

    # ~3 MFLOP / batch element, ~0.65 MB total HBM traffic
    cost = pl.CostEstimate(flops=6_000_000, transcendentals=0, bytes_accessed=650_000)

    return pl.pallas_call(
        _decoder_kernel,
        out_shape=jax.ShapeDtypeStruct((B, nclass, hw_out), jnp.float32),
        grid=(B,),
        in_specs=in_specs,
        out_specs=out_spec,
        compiler_params=pltpu.CompilerParams(dimension_semantics=("parallel",)),
        cost_estimate=cost,
    )(*args)


# --------------------------- pure-JAX references ------------------------------
def all_mlp_decoder_ref_module(xs_cf, rT_list, wT_list, b_list,
                               wfuT, bfu_col, wclT, bcl_col, routT):
    """Faithful f32 mirror of the PyTorch module (per-level conv+BN+ReLU, resize,
    reversed concat, linear_fuse, classifier, final resize) — channels-first."""
    B = xs_cf[0].shape[0]
    outs = []
    for b in range(B):
        hs = []
        for i in range(NUM_LEVELS):
            h = jnp.dot(wT_list[i], xs_cf[i][b],
                        preferred_element_type=jnp.float32) + b_list[i]
            h = jnp.maximum(h, 0.0)
            if rT_list[i] is not None:
                h = jnp.dot(h, rT_list[i], preferred_element_type=jnp.float32)
            hs.append(h)
        concat = jnp.concatenate(hs[::-1], axis=0)                       # reversed cat on channels
        fused = jnp.dot(wfuT, concat, preferred_element_type=jnp.float32) + bfu_col
        logits = jnp.dot(wclT, fused, preferred_element_type=jnp.float32) + bcl_col
        outs.append(jnp.dot(logits, routT, preferred_element_type=jnp.float32))
    return jnp.stack(outs)


def all_mlp_decoder_ref_fused(xs_cf, rT_list, wT_list, b_list, cf_list, bias_tot, routT,
                              dtype=jnp.bfloat16):
    """Op-for-op mirror of the kernel (same fusion + operand quantization)."""
    B = xs_cf[0].shape[0]
    outs = []
    for b in range(B):
        acc = None
        for i in range(NUM_LEVELS):
            h = jnp.dot(wT_list[i].astype(dtype), xs_cf[i][b].astype(dtype),
                        preferred_element_type=jnp.float32) + b_list[i]
            h = jnp.maximum(h, 0.0).astype(dtype)
            p = jnp.dot(cf_list[i].astype(dtype), h, preferred_element_type=jnp.float32)
            if rT_list[i] is not None:
                p = jnp.dot(p.astype(dtype), rT_list[i].astype(dtype),
                            preferred_element_type=jnp.float32)
            acc = p if acc is None else acc + p
        logits = (acc + bias_tot).astype(dtype)
        outs.append(jnp.dot(logits, routT.astype(dtype),
                            preferred_element_type=jnp.float32))
    return jnp.stack(outs)


# ---------------------------- param construction -----------------------------
def _fold_bn(w, b, gamma, beta, mean, var, eps=BN_EPS):
    s = gamma / jnp.sqrt(var + eps)
    return (w * s[None, :]).astype(jnp.float32), ((b - mean) * s + beta).astype(jnp.float32)


if __name__ == "__main__":
    key = jax.random.PRNGKey(0)
    keys = iter(jax.random.split(key, 128))

    # ------------------ deterministic synthetic inputs (NCHW) ----------------
    feats_nchw = []
    for c, (h, w) in zip(FEATURE_DIMS, SPATIAL):
        feats_nchw.append(jax.random.normal(next(keys), (BATCH, c, h, w), dtype=jnp.float32))

    # NCHW -> channels-first flattened slabs [B, C, H*W] (pure reshape, no transpose)
    xs_cf = [x.reshape(BATCH, x.shape[1], x.shape[2] * x.shape[3]) for x in feats_nchw]

    # ------------------ deterministic synthetic parameters -------------------
    # linear_c: per-level 1x1 conv + folded BN (ReLU applied in-kernel), transposed
    wT_list, b_list = [], []
    for c_in in FEATURE_DIMS:
        w = jax.random.normal(next(keys), (c_in, C_INT), dtype=jnp.float32) / np.sqrt(c_in)
        b = 0.1 * jax.random.normal(next(keys), (C_INT,), dtype=jnp.float32)
        gamma = 1.0 + 0.1 * jax.random.normal(next(keys), (C_INT,), dtype=jnp.float32)
        beta = 0.1 * jax.random.normal(next(keys), (C_INT,), dtype=jnp.float32)
        mean = 0.1 * jax.random.normal(next(keys), (C_INT,), dtype=jnp.float32)
        var = 0.5 + jax.random.uniform(next(keys), (C_INT,), dtype=jnp.float32)
        wf_, bf_ = _fold_bn(w, b, gamma, beta, mean, var)
        wT_list.append(wf_.T)                    # [C_INT, c_in]
        b_list.append(bf_.reshape(C_INT, 1))     # column bias (broadcast over lanes)

    # linear_fuse: 1x1 conv (4*C_INT -> C_INT) + BN, no activation
    wfu = jax.random.normal(next(keys), (NUM_LEVELS * C_INT, C_INT), dtype=jnp.float32) \
        / np.sqrt(NUM_LEVELS * C_INT)
    bfu = 0.1 * jax.random.normal(next(keys), (C_INT,), dtype=jnp.float32)
    gamma = 1.0 + 0.1 * jax.random.normal(next(keys), (C_INT,), dtype=jnp.float32)
    beta = 0.1 * jax.random.normal(next(keys), (C_INT,), dtype=jnp.float32)
    mean = 0.1 * jax.random.normal(next(keys), (C_INT,), dtype=jnp.float32)
    var = 0.5 + jax.random.uniform(next(keys), (C_INT,), dtype=jnp.float32)
    wfu, bfu = _fold_bn(wfu, bfu, gamma, beta, mean, var)
    wfuT = wfu.T                                                        # [C_INT, 4*C_INT]
    # level i sits at reversed slot j = NUM_LEVELS-1-i of the concatenated channels
    f_list = [wfuT[:, (NUM_LEVELS - 1 - i) * C_INT:(NUM_LEVELS - i) * C_INT]
              for i in range(NUM_LEVELS)]                               # each [C_INT, C_INT]
    bfu_col = bfu.reshape(C_INT, 1)

    # classifier: plain 1x1 conv (C_INT -> num_classes) with bias, transposed
    wcl = jax.random.normal(next(keys), (C_INT, NUM_CLASSES), dtype=jnp.float32) / np.sqrt(C_INT)
    bcl = 0.1 * jax.random.normal(next(keys), (NUM_CLASSES,), dtype=jnp.float32)
    wclT = wcl.T                                                        # [NUM_CLASSES, C_INT]
    bcl_col = bcl.reshape(NUM_CLASSES, 1)

    # classifier fused into per-level fuse slices (exact: no nonlinearity between,
    # dropout is identity in eval)
    cf_list = [jnp.dot(wclT, f) for f in f_list]                        # each [NUM_CLASSES, C_INT]
    bias_tot = jnp.dot(wclT, bfu_col) + bcl_col                         # [NUM_CLASSES, 1]

    # bilinear resize operators (align_corners=False), transposed [HW_in, HW_out].
    # Level 0 resizes (16,16)->(16,16): identity -> skipped entirely.
    H0, W0 = SPATIAL[0]
    rT_list = [None] + [jnp.asarray(_resize_matrix_2d((H0, W0), hw)).T for hw in SPATIAL[1:]]
    routT = jnp.asarray(_resize_matrix_2d(LABEL_SIZE, (H0, W0))).T      # [HW0, HW_label]

    # ------------------------------- run --------------------------------------
    out = all_mlp_decoder_pallas(xs_cf, rT_list, wT_list, b_list, cf_list, bias_tot, routT)
    out = jax.block_until_ready(out)

    # kernel-matched reference (same fusion, bf16 MXU operands, f32 accumulation)
    ref_bf16 = all_mlp_decoder_ref_fused(xs_cf, rT_list, wT_list, b_list,
                                         cf_list, bias_tot, routT, dtype=jnp.bfloat16)
    ref_bf16 = jax.block_until_ready(ref_bf16)
    np.testing.assert_allclose(np.asarray(out), np.asarray(ref_bf16), rtol=1e-2, atol=1e-2)

    # faithful f32 reference (original module semantics, no fusion) — loose tolerance
    # absorbs bf16 MXU operands
    ref_f32 = all_mlp_decoder_ref_module(xs_cf, rT_list, wT_list, b_list,
                                         wfuT, bfu_col, wclT, bcl_col, routT)
    ref_f32 = jax.block_until_ready(ref_f32)
    np.testing.assert_allclose(np.asarray(out), np.asarray(ref_f32), rtol=3e-2, atol=3e-2)

    # PyTorch NCHW convention: [B, num_classes, H_label, W_label] — plain reshape, no transpose
    H_lbl, W_lbl = LABEL_SIZE
    logits_nchw = out.reshape(BATCH, NUM_CLASSES, H_lbl, W_lbl)
    assert logits_nchw.shape == (BATCH, NUM_CLASSES, H_lbl, W_lbl)

    print("KERNEL_OK")
</pallas_src>

<mosaic_0001>
module attributes {stable_mosaic.version = 11 : i64} {
  func.func @_decoder_kernel(%arg0: i32, %arg1: memref<1x8x256xbf16, #tpu.memory_space<vmem>>, %arg2: memref<1x16x64xbf16, #tpu.memory_space<vmem>>, %arg3: memref<1x24x16xbf16, #tpu.memory_space<vmem>>, %arg4: memref<1x32x4xbf16, #tpu.memory_space<vmem>>, %arg5: memref<64x256xbf16, #tpu.memory_space<vmem>>, %arg6: memref<16x256xbf16, #tpu.memory_space<vmem>>, %arg7: memref<4x256xbf16, #tpu.memory_space<vmem>>, %arg8: memref<32x8xbf16, #tpu.memory_space<vmem>>, %arg9: memref<32x1xf32, #tpu.memory_space<vmem>>, %arg10: memref<32x16xbf16, #tpu.memory_space<vmem>>, %arg11: memref<32x1xf32, #tpu.memory_space<vmem>>, %arg12: memref<32x24xbf16, #tpu.memory_space<vmem>>, %arg13: memref<32x1xf32, #tpu.memory_space<vmem>>, %arg14: memref<32x32xbf16, #tpu.memory_space<vmem>>, %arg15: memref<32x1xf32, #tpu.memory_space<vmem>>, %arg16: memref<5x32xbf16, #tpu.memory_space<vmem>>, %arg17: memref<5x32xbf16, #tpu.memory_space<vmem>>, %arg18: memref<5x32xbf16, #tpu.memory_space<vmem>>, %arg19: memref<5x32xbf16, #tpu.memory_space<vmem>>, %arg20: memref<5x1xf32, #tpu.memory_space<vmem>>, %arg21: memref<256x1024xbf16, #tpu.memory_space<vmem>>, %arg22: memref<1x5x1024xf32, #tpu.memory_space<vmem>>) attributes {dimension_semantics = [#tpu.dimension_semantics<parallel>], iteration_bounds = array<i64: 2>, scalar_prefetch = 0 : i64, scratch_operands = 0 : i64, tpu.core_type = #tpu.core_type<tc>, window_params = [{transform_indices = @transform_0, window_bounds = array<i64: 1, 8, 256>}, {transform_indices = @transform_1, window_bounds = array<i64: 1, 16, 64>}, {transform_indices = @transform_2, window_bounds = array<i64: 1, 24, 16>}, {transform_indices = @transform_3, window_bounds = array<i64: 1, 32, 4>}, {pipeline_mode = #tpu.pipeline_mode<synchronous>, transform_indices = @transform_4, window_bounds = array<i64: 64, 256>}, {pipeline_mode = #tpu.pipeline_mode<synchronous>, transform_indices = @transform_5, window_bounds = array<i64: 16, 256>}, {pipeline_mode = #tpu.pipeline_mode<synchronous>, transform_indices = @transform_6, window_bounds = array<i64: 4, 256>}, {pipeline_mode = #tpu.pipeline_mode<synchronous>, transform_indices = @transform_7, window_bounds = array<i64: 32, 8>}, {pipeline_mode = #tpu.pipeline_mode<synchronous>, transform_indices = @transform_8, window_bounds = array<i64: 32, 1>}, {pipeline_mode = #tpu.pipeline_mode<synchronous>, transform_indices = @transform_9, window_bounds = array<i64: 32, 16>}, {pipeline_mode = #tpu.pipeline_mode<synchronous>, transform_indices = @transform_10, window_bounds = array<i64: 32, 1>}, {pipeline_mode = #tpu.pipeline_mode<synchronous>, transform_indices = @transform_11, window_bounds = array<i64: 32, 24>}, {pipeline_mode = #tpu.pipeline_mode<synchronous>, transform_indices = @transform_12, window_bounds = array<i64: 32, 1>}, {pipeline_mode = #tpu.pipeline_mode<synchronous>, transform_indices = @transform_13, window_bounds = array<i64: 32, 32>}, {pipeline_mode = #tpu.pipeline_mode<synchronous>, transform_indices = @transform_14, window_bounds = array<i64: 32, 1>}, {pipeline_mode = #tpu.pipeline_mode<synchronous>, transform_indices = @transform_15, window_bounds = array<i64: 5, 32>}, {pipeline_mode = #tpu.pipeline_mode<synchronous>, transform_indices = @transform_16, window_bounds = array<i64: 5, 32>}, {pipeline_mode = #tpu.pipeline_mode<synchronous>, transform_indices = @transform_17, window_bounds = array<i64: 5, 32>}, {pipeline_mode = #tpu.pipeline_mode<synchronous>, transform_indices = @transform_18, window_bounds = array<i64: 5, 32>}, {pipeline_mode = #tpu.pipeline_mode<synchronous>, transform_indices = @transform_19, window_bounds = array<i64: 5, 1>}, {pipeline_mode = #tpu.pipeline_mode<synchronous>, transform_indices = @transform_20, window_bounds = array<i64: 256, 1024>}, {transform_indices = @transform_21, window_bounds = array<i64: 1, 5, 1024>}]} {
    %c0 = arith.constant 0 : index
    %c0_0 = arith.constant 0 : index
    %c0_1 = arith.constant 0 : index
    %0 = vector.load %arg1[%c0, %c0_0, %c0_1] : memref<1x8x256xbf16, #tpu.memory_space<vmem>>, vector<1x8x256xbf16>
    %1 = vector.shape_cast %0 : vector<1x8x256xbf16> to vector<8x256xbf16>
    %c0_2 = arith.constant 0 : index
    %c0_3 = arith.constant 0 : index
    %2 = vector.load %arg8[%c0_2, %c0_3] : memref<32x8xbf16, #tpu.memory_space<vmem>>, vector<32x8xbf16>
    %cst = arith.constant dense<0.000000e+00> : vector<32x256xf32>
    %3 = tpu.matmul %2, %1, %cst {dimension_numbers = #tpu.dot_dimension_numbers<[1], [0], [0], [1], [0, 0, 1, 1], [], []>} : vector<32x8xbf16>, vector<8x256xbf16>, vector<32x256xf32> -> vector<32x256xf32>
    %c0_4 = arith.constant 0 : index
    %c0_5 = arith.constant 0 : index
    %4 = vector.load %arg9[%c0_4, %c0_5] : memref<32x1xf32, #tpu.memory_space<vmem>>, vector<32x1xf32>
    %5 = vector.broadcast %4 : vector<32x1xf32> to vector<32x256xf32>
    %6 = arith.addf %3, %5 : vector<32x256xf32>
    %cst_6 = arith.constant 0.000000e+00 : f32
    %7 = vector.broadcast %cst_6 : f32 to vector<32x256xf32>
    %8 = arith.maximumf %6, %7 : vector<32x256xf32>
    %9 = arith.truncf %8 : vector<32x256xf32> to vector<32x256xbf16>
    %c0_7 = arith.constant 0 : index
    %c0_8 = arith.constant 0 : index
    %10 = vector.load %arg16[%c0_7, %c0_8] : memref<5x32xbf16, #tpu.memory_space<vmem>>, vector<5x32xbf16>
    %cst_9 = arith.constant dense<0.000000e+00> : vector<5x256xf32>
    %11 = tpu.matmul %10, %9, %cst_9 {dimension_numbers = #tpu.dot_dimension_numbers<[1], [0], [0], [1], [0, 0, 1, 1], [], []>} : vector<5x32xbf16>, vector<32x256xbf16>, vector<5x256xf32> -> vector<5x256xf32>
    %c0_10 = arith.constant 0 : index
    %c0_11 = arith.constant 0 : index
    %c0_12 = arith.constant 0 : index
    %12 = vector.load %arg2[%c0_10, %c0_11, %c0_12] : memref<1x16x64xbf16, #tpu.memory_space<vmem>>, vector<1x16x64xbf16>
    %13 = vector.shape_cast %12 : vector<1x16x64xbf16> to vector<16x64xbf16>
    %c0_13 = arith.constant 0 : index
    %c0_14 = arith.constant 0 : index
    %14 = vector.load %arg10[%c0_13, %c0_14] : memref<32x16xbf16, #tpu.memory_space<vmem>>, vector<32x16xbf16>
    %cst_15 = arith.constant dense<0.000000e+00> : vector<32x64xf32>
    %15 = tpu.matmul %14, %13, %cst_15 {dimension_numbers = #tpu.dot_dimension_numbers<[1], [0], [0], [1], [0, 0, 1, 1], [], []>} : vector<32x16xbf16>, vector<16x64xbf16>, vector<32x64xf32> -> vector<32x64xf32>
    %c0_16 = arith.constant 0 : index
    %c0_17 = arith.constant 0 : index
    %16 = vector.load %arg11[%c0_16, %c0_17] : memref<32x1xf32, #tpu.memory_space<vmem>>, vector<32x1xf32>
    %17 = vector.broadcast %16 : vector<32x1xf32> to vector<32x64xf32>
    %18 = arith.addf %15, %17 : vector<32x64xf32>
    %cst_18 = arith.constant 0.000000e+00 : f32
    %19 = vector.broadcast %cst_18 : f32 to vector<32x64xf32>
    %20 = arith.maximumf %18, %19 : vector<32x64xf32>
    %21 = arith.truncf %20 : vector<32x64xf32> to vector<32x64xbf16>
    %c0_19 = arith.constant 0 : index
    %c0_20 = arith.constant 0 : index
    %22 = vector.load %arg17[%c0_19, %c0_20] : memref<5x32xbf16, #tpu.memory_space<vmem>>, vector<5x32xbf16>
    %cst_21 = arith.constant dense<0.000000e+00> : vector<5x64xf32>
    %23 = tpu.matmul %22, %21, %cst_21 {dimension_numbers = #tpu.dot_dimension_numbers<[1], [0], [0], [1], [0, 0, 1, 1], [], []>} : vector<5x32xbf16>, vector<32x64xbf16>, vector<5x64xf32> -> vector<5x64xf32>
    %24 = arith.truncf %23 : vector<5x64xf32> to vector<5x64xbf16>
    %c0_22 = arith.constant 0 : index
    %c0_23 = arith.constant 0 : index
    %25 = vector.load %arg5[%c0_22, %c0_23] : memref<64x256xbf16, #tpu.memory_space<vmem>>, vector<64x256xbf16>
    %cst_24 = arith.constant dense<0.000000e+00> : vector<5x256xf32>
    %26 = tpu.matmul %24, %25, %cst_24 {dimension_numbers = #tpu.dot_dimension_numbers<[1], [0], [0], [1], [0, 0, 1, 1], [], []>} : vector<5x64xbf16>, vector<64x256xbf16>, vector<5x256xf32> -> vector<5x256xf32>
    %27 = arith.addf %11, %26 : vector<5x256xf32>
    %c0_25 = arith.constant 0 : index
    %c0_26 = arith.constant 0 : index
    %c0_27 = arith.constant 0 : index
    %28 = vector.load %arg3[%c0_25, %c0_26, %c0_27] : memref<1x24x16xbf16, #tpu.memory_space<vmem>>, vector<1x24x16xbf16>
    %29 = vector.shape_cast %28 : vector<1x24x16xbf16> to vector<24x16xbf16>
    %c0_28 = arith.constant 0 : index
    %c0_29 = arith.constant 0 : index
    %30 = vector.load %arg12[%c0_28, %c0_29] : memref<32x24xbf16, #tpu.memory_space<vmem>>, vector<32x24xbf16>
    %cst_30 = arith.constant dense<0.000000e+00> : vector<32x16xf32>
    %31 = tpu.matmul %30, %29, %cst_30 {dimension_numbers = #tpu.dot_dimension_numbers<[1], [0], [0], [1], [0, 0, 1, 1], [], []>} : vector<32x24xbf16>, vector<24x16xbf16>, vector<32x16xf32> -> vector<32x16xf32>
    %c0_31 = arith.constant 0 : index
    %c0_32 = arith.constant 0 : index
    %32 = vector.load %arg13[%c0_31, %c0_32] : memref<32x1xf32, #tpu.memory_space<vmem>>, vector<32x1xf32>
    %33 = vector.broadcast %32 : vector<32x1xf32> to vector<32x16xf32>
    %34 = arith.addf %31, %33 : vector<32x16xf32>
    %cst_33 = arith.constant 0.000000e+00 : f32
    %35 = vector.broadcast %cst_33 : f32 to vector<32x16xf32>
    %36 = arith.maximumf %34, %35 : vector<32x16xf32>
    %37 = arith.truncf %36 : vector<32x16xf32> to vector<32x16xbf16>
    %c0_34 = arith.constant 0 : index
    %c0_35 = arith.constant 0 : index
    %38 = vector.load %arg18[%c0_34, %c0_35] : memref<5x32xbf16, #tpu.memory_space<vmem>>, vector<5x32xbf16>
    %cst_36 = arith.constant dense<0.000000e+00> : vector<5x16xf32>
    %39 = tpu.matmul %38, %37, %cst_36 {dimension_numbers = #tpu.dot_dimension_numbers<[1], [0], [0], [1], [0, 0, 1, 1], [], []>} : vector<5x32xbf16>, vector<32x16xbf16>, vector<5x16xf32> -> vector<5x16xf32>
    %40 = arith.truncf %39 : vector<5x16xf32> to vector<5x16xbf16>
    %c0_37 = arith.constant 0 : index
    %c0_38 = arith.constant 0 : index
    %41 = vector.load %arg6[%c0_37, %c0_38] : memref<16x256xbf16, #tpu.memory_space<vmem>>, vector<16x256xbf16>
    %cst_39 = arith.constant dense<0.000000e+00> : vector<5x256xf32>
    %42 = tpu.matmul %40, %41, %cst_39 {dimension_numbers = #tpu.dot_dimension_numbers<[1], [0], [0], [1], [0, 0, 1, 1], [], []>} : vector<5x16xbf16>, vector<16x256xbf16>, vector<5x256xf32> -> vector<5x256xf32>
    %43 = arith.addf %27, %42 : vector<5x256xf32>
    %c0_40 = arith.constant 0 : index
    %c0_41 = arith.constant 0 : index
    %c0_42 = arith.constant 0 : index
    %44 = vector.load %arg4[%c0_40, %c0_41, %c0_42] : memref<1x32x4xbf16, #tpu.memory_space<vmem>>, vector<1x32x4xbf16>
    %45 = vector.shape_cast %44 : vector<1x32x4xbf16> to vector<32x4xbf16>
    %c0_43 = arith.constant 0 : index
    %c0_44 = arith.constant 0 : index
    %46 = vector.load %arg14[%c0_43, %c0_44] : memref<32x32xbf16, #tpu.memory_space<vmem>>, vector<32x32xbf16>
    %cst_45 = arith.constant dense<0.000000e+00> : vector<32x4xf32>
    %47 = tpu.matmul %46, %45, %cst_45 {dimension_numbers = #tpu.dot_dimension_numbers<[1], [0], [0], [1], [0, 0, 1, 1], [], []>} : vector<32x32xbf16>, vector<32x4xbf16>, vector<32x4xf32> -> vector<32x4xf32>
    %c0_46 = arith.constant 0 : index
    %c0_47 = arith.constant 0 : index
    %48 = vector.load %arg15[%c0_46, %c0_47] : memref<32x1xf32, #tpu.memory_space<vmem>>, vector<32x1xf32>
    %49 = vector.broadcast %48 : vector<32x1xf32> to vector<32x4xf32>
    %50 = arith.addf %47, %49 : vector<32x4xf32>
    %cst_48 = arith.constant 0.000000e+00 : f32
    %51 = vector.broadcast %cst_48 : f32 to vector<32x4xf32>
    %52 = arith.maximumf %50, %51 : vector<32x4xf32>
    %53 = arith.truncf %52 : vector<32x4xf32> to vector<32x4xbf16>
    %c0_49 = arith.constant 0 : index
    %c0_50 = arith.constant 0 : index
    %54 = vector.load %arg19[%c0_49, %c0_50] : memref<5x32xbf16, #tpu.memory_space<vmem>>, vector<5x32xbf16>
    %cst_51 = arith.constant dense<0.000000e+00> : vector<5x4xf32>
    %55 = tpu.matmul %54, %53, %cst_51 {dimension_numbers = #tpu.dot_dimension_numbers<[1], [0], [0], [1], [0, 0, 1, 1], [], []>} : vector<5x32xbf16>, vector<32x4xbf16>, vector<5x4xf32> -> vector<5x4xf32>
    %56 = arith.truncf %55 : vector<5x4xf32> to vector<5x4xbf16>
    %c0_52 = arith.constant 0 : index
    %c0_53 = arith.constant 0 : index
    %57 = vector.load %arg7[%c0_52, %c0_53] : memref<4x256xbf16, #tpu.memory_space<vmem>>, vector<4x256xbf16>
    %cst_54 = arith.constant dense<0.000000e+00> : vector<5x256xf32>
    %58 = tpu.matmul %56, %57, %cst_54 {dimension_numbers = #tpu.dot_dimension_numbers<[1], [0], [0], [1], [0, 0, 1, 1], [], []>} : vector<5x4xbf16>, vector<4x256xbf16>, vector<5x256xf32> -> vector<5x256xf32>
    %59 = arith.addf %43, %58 : vector<5x256xf32>
    %c0_55 = arith.constant 0 : index
    %c0_56 = arith.constant 0 : index
    %60 = vector.load %arg20[%c0_55, %c0_56] : memref<5x1xf32, #tpu.memory_space<vmem>>, vector<5x1xf32>
    %61 = vector.broadcast %60 : vector<5x1xf32> to vector<5x256xf32>
    %62 = arith.addf %59, %61 : vector<5x256xf32>
    %63 = arith.truncf %62 : vector<5x256xf32> to vector<5x256xbf16>
    %c0_57 = arith.constant 0 : index
    %c0_58 = arith.constant 0 : index
    %64 = vector.load %arg21[%c0_57, %c0_58] : memref<256x1024xbf16, #tpu.memory_space<vmem>>, vector<256x1024xbf16>
    %cst_59 = arith.constant dense<0.000000e+00> : vector<5x1024xf32>
    %65 = tpu.matmul %63, %64, %cst_59 {dimension_numbers = #tpu.dot_dimension_numbers<[1], [0], [0], [1], [0, 0, 1, 1], [], []>} : vector<5x256xbf16>, vector<256x1024xbf16>, vector<5x1024xf32> -> vector<5x1024xf32>
    %c0_60 = arith.constant 0 : index
    %c0_61 = arith.constant 0 : index
    %c0_62 = arith.constant 0 : index
    %66 = vector.load %arg22[%c0_60, %c0_61, %c0_62] : memref<1x5x1024xf32, #tpu.memory_space<vmem>>, vector<1x5x1024xf32>
    %67 = vector.shape_cast %66 : vector<1x5x1024xf32> to vector<5x1024xf32>
    %68 = vector.shape_cast %65 : vector<5x1024xf32> to vector<1x5x1024xf32>
    tpu.vector_store %arg22[%c0_60, %c0_61, %c0_62], %68 {strides = array<i32>} : memref<1x5x1024xf32, #tpu.memory_space<vmem>>, vector<1x5x1024xf32>,
    return
  }
  func.func @transform_0(%arg0: i32) -> (i32, i32, i32) {
    %c0_i32 = arith.constant 0 : i32
    %c0_i32_0 = arith.constant 0 : i32
    %c0_i32_1 = arith.constant 0 : i32
    return %arg0, %c0_i32, %c0_i32_0 : i32, i32, i32
  }
  func.func @transform_1(%arg0: i32) -> (i32, i32, i32) {
    %c0_i32 = arith.constant 0 : i32
    %c0_i32_0 = arith.constant 0 : i32
    %c0_i32_1 = arith.constant 0 : i32
    return %arg0, %c0_i32, %c0_i32_0 : i32, i32, i32
  }
  func.func @transform_2(%arg0: i32) -> (i32, i32, i32) {
    %c0_i32 = arith.constant 0 : i32
    %c0_i32_0 = arith.constant 0 : i32
    %c0_i32_1 = arith.constant 0 : i32
    return %arg0, %c0_i32, %c0_i32_0 : i32, i32, i32
  }
  func.func @transform_3(%arg0: i32) -> (i32, i32, i32) {
    %c0_i32 = arith.constant 0 : i32
    %c0_i32_0 = arith.constant 0 : i32
    %c0_i32_1 = arith.constant 0 : i32
    return %arg0, %c0_i32, %c0_i32_0 : i32, i32, i32
  }
  func.func @transform_4(%arg0: i32) -> (i32, i32) {
    %c0_i32 = arith.constant 0 : i32
    %c0_i32_0 = arith.constant 0 : i32
    %c0_i32_1 = arith.constant 0 : i32
    return %c0_i32, %c0_i32_0 : i32, i32
  }
  func.func @transform_5(%arg0: i32) -> (i32, i32) {
    %c0_i32 = arith.constant 0 : i32
    %c0_i32_0 = arith.constant 0 : i32
    %c0_i32_1 = arith.constant 0 : i32
    return %c0_i32, %c0_i32_0 : i32, i32
  }
  func.func @transform_6(%arg0: i32) -> (i32, i32) {
    %c0_i32 = arith.constant 0 : i32
    %c0_i32_0 = arith.constant 0 : i32
    %c0_i32_1 = arith.constant 0 : i32
    return %c0_i32, %c0_i32_0 : i32, i32
  }
  func.func @transform_7(%arg0: i32) -> (i32, i32) {
    %c0_i32 = arith.constant 0 : i32
    %c0_i32_0 = arith.constant 0 : i32
    %c0_i32_1 = arith.constant 0 : i32
    return %c0_i32, %c0_i32_0 : i32, i32
  }
  func.func @transform_8(%arg0: i32) -> (i32, i32) {
    %c0_i32 = arith.constant 0 : i32
    %c0_i32_0 = arith.constant 0 : i32
    %c0_i32_1 = arith.constant 0 : i32
    return %c0_i32, %c0_i32_0 : i32, i32
  }
  func.func @transform_9(%arg0: i32) -> (i32, i32) {
    %c0_i32 = arith.constant 0 : i32
    %c0_i32_0 = arith.constant 0 : i32
    %c0_i32_1 = arith.constant 0 : i32
    return %c0_i32, %c0_i32_0 : i32, i32
  }
  func.func @transform_10(%arg0: i32) -> (i32, i32) {
    %c0_i32 = arith.constant 0 : i32
    %c0_i32_0 = arith.constant 0 : i32
    %c0_i32_1 = arith.constant 0 : i32
    return %c0_i32, %c0_i32_0 : i32, i32
  }
  func.func @transform_11(%arg0: i32) -> (i32, i32) {
    %c0_i32 = arith.constant 0 : i32
    %c0_i32_0 = arith.constant 0 : i32
    %c0_i32_1 = arith.constant 0 : i32
    return %c0_i32, %c0_i32_0 : i32, i32
  }
  func.func @transform_12(%arg0: i32) -> (i32, i32) {
    %c0_i32 = arith.constant 0 : i32
    %c0_i32_0 = arith.constant 0 : i32
    %c0_i32_1 = arith.constant 0 : i32
    return %c0_i32, %c0_i32_0 : i32, i32
  }
  func.func @transform_13(%arg0: i32) -> (i32, i32) {
    %c0_i32 = arith.constant 0 : i32
    %c0_i32_0 = arith.constant 0 : i32
    %c0_i32_1 = arith.constant 0 : i32
    return %c0_i32, %c0_i32_0 : i32, i32
  }
  func.func @transform_14(%arg0: i32) -> (i32, i32) {
    %c0_i32 = arith.constant 0 : i32
    %c0_i32_0 = arith.constant 0 : i32
    %c0_i32_1 = arith.constant 0 : i32
    return %c0_i32, %c0_i32_0 : i32, i32
  }
  func.func @transform_15(%arg0: i32) -> (i32, i32) {
    %c0_i32 = arith.constant 0 : i32
    %c0_i32_0 = arith.constant 0 : i32
    %c0_i32_1 = arith.constant 0 : i32
    return %c0_i32, %c0_i32_0 : i32, i32
  }
  func.func @transform_16(%arg0: i32) -> (i32, i32) {
    %c0_i32 = arith.constant 0 : i32
    %c0_i32_0 = arith.constant 0 : i32
    %c0_i32_1 = arith.constant 0 : i32
    return %c0_i32, %c0_i32_0 : i32, i32
  }
  func.func @transform_17(%arg0: i32) -> (i32, i32) {
    %c0_i32 = arith.constant 0 : i32
    %c0_i32_0 = arith.constant 0 : i32
    %c0_i32_1 = arith.constant 0 : i32
    return %c0_i32, %c0_i32_0 : i32, i32
  }
  func.func @transform_18(%arg0: i32) -> (i32, i32) {
    %c0_i32 = arith.constant 0 : i32
    %c0_i32_0 = arith.constant 0 : i32
    %c0_i32_1 = arith.constant 0 : i32
    return %c0_i32, %c0_i32_0 : i32, i32
  }
  func.func @transform_19(%arg0: i32) -> (i32, i32) {
    %c0_i32 = arith.constant 0 : i32
    %c0_i32_0 = arith.constant 0 : i32
    %c0_i32_1 = arith.constant 0 : i32
    return %c0_i32, %c0_i32_0 : i32, i32
  }
  func.func @transform_20(%arg0: i32) -> (i32, i32) {
    %c0_i32 = arith.constant 0 : i32
    %c0_i32_0 = arith.constant 0 : i32
    %c0_i32_1 = arith.constant 0 : i32
    return %c0_i32, %c0_i32_0 : i32, i32
  }
  func.func @transform_21(%arg0: i32) -> (i32, i32, i32) {
    %c0_i32 = arith.constant 0 : i32
    %c0_i32_0 = arith.constant 0 : i32
    %c0_i32_1 = arith.constant 0 : i32
    return %arg0, %c0_i32, %c0_i32_0 : i32, i32, i32
  }
}

</mosaic_0001>

<bundles_post_ra>
// kernel: tpu_custom_call.1
= control target key start
LH: loop header
LB: loop body
LE: loop exit
PB: predicated region body
PF: predicated region fallthrough
CT: control target
= control target key end

     0   :  { %s3375_s0 = inlined_call_operand.vmem [shape: bf16[2,8,256], index: 0, kind: input, shape index: {}]   ;;  %s3376_s1 = inlined_call_operand.vmem [shape: bf16[2,16,64], index: 1, kind: input, shape index: {}]   ;;  %s3377_s2 = inlined_call_operand.vmem [shape: bf16[2,24,16], index: 2, kind: input, shape index: {}]   ;;  %s3378_s3 = inlined_call_operand.vmem [shape: bf16[2,32,4], index: 3, kind: input, shape index: {}]   ;;  %s3379_s4 = inlined_call_operand.vmem [shape: bf16[64,256], index: 4, kind: input, shape index: {}]   ;;  %s3380_s5 = inlined_call_operand.vmem [shape: bf16[16,256], index: 5, kind: input, shape index: {}]   ;;  %s3381_s6 = inlined_call_operand.vmem [shape: bf16[4,256], index: 6, kind: input, shape index: {}]   ;;  %s3382_s7 = inlined_call_operand.vmem [shape: bf16[32,8], index: 7, kind: input, shape index: {}]   ;;  %s3383_s8 = inlined_call_operand.vmem [shape: f32[32,1], index: 8, kind: input, shape index: {}]   ;;  %s3384_s9 = inlined_call_operand.vmem [shape: bf16[32,16], index: 9, kind: input, shape index: {}]   ;;  %s3385_s10 = inlined_call_operand.vmem [shape: f32[32,1], index: 10, kind: input, shape index: {}]   ;;  %s3386_s11 = inlined_call_operand.vmem [shape: bf16[32,24], index: 11, kind: input, shape index: {}]   ;;  %s3387_s12 = inlined_call_operand.vmem [shape: f32[32,1], index: 12, kind: input, shape index: {}]   ;;  %s3388_s13 = inlined_call_operand.vmem [shape: bf16[32,32], index: 13, kind: input, shape index: {}]   ;;  %s3389_s14 = inlined_call_operand.vmem [shape: f32[32,1], index: 14, kind: input, shape index: {}]   ;;  %s3390_s15 = inlined_call_operand.vmem [shape: bf16[5,32], index: 15, kind: input, shape index: {}]   ;;  %s3391_s16 = inlined_call_operand.vmem [shape: bf16[5,32], index: 16, kind: input, shape index: {}]   ;;  %s3392_s17 = inlined_call_operand.vmem [shape: bf16[5,32], index: 17, kind: input, shape index: {}]   ;;  %s3393_s18 = inlined_call_operand.vmem [shape: bf16[5,32], index: 18, kind: input, shape index: {}]   ;;  %s3394_s19 = inlined_call_operand.vmem [shape: f32[5,1], index: 19, kind: input, shape index: {}]   ;;  %s3395_s20 = inlined_call_operand.hbm [shape: bf16[256,1024], index: 20, kind: input, shape index: {}]   ;;  %s3396_s21 = inlined_call_operand.vmem [shape: f32[2,5,1024], index: 21, kind: output, shape index: {}]  }
   0x1   :  { %3401 = sst [smem:[#allocation5_spill]] %s3375_s0 }
   0x2   :  { %3402 = sst [smem:[#allocation6_spill]] %s3376_s1 }
   0x3   :  { %3403 = sst [smem:[#allocation7_spill]] %s3377_s2 }
   0x4   :  { %3404 = sst [smem:[#allocation8_spill]] %s3378_s3 }
   0x5   :  { %3405 = sst [smem:[#allocation9_spill]] %s3379_s4 }
   0x6   :  { %3406 = sst [smem:[#allocation10_spill]] %s3380_s5 }
   0x7   :  { %26 = vsyncpa [#allocation3], 0  ;;  %s3116_s2 = smov 0  }
   0x8 LB: > { %s3122_s25 = sadd.s32 4294967295, %s2998_s2   ;;  %p2645_p0 = scmp.ge.s32.totalorder %s2998_s2, 1  ;;  %s2998_s2 = sphi %s3116_s2, %s32_s2  }
   0x9   : > { %p524_p1 = scmp.lt.s32.totalorder %s2998_s2, 3  ;;  %s3000_s26 = smov [#allocation2]  }
   0xa   : > { %s584_s27 = sshll.u32 %s3000_s26, 4  ;;  %p3399_p3 = scmp.eq.s32.totalorder %s3122_s25, 0  ;;  %s585_s27 = int_to_ptr.vmem [resolvable:$true] %s584_s27 }
   0xb   : > { %p3126_p2 = pnand %p2645_p0, %p524_p1  ;;  %s2960_s4 = scalar_lea.hbm %s3395_s20, 16384 }
   0xc   : > { %p2961_p6 = scmp.ne.s32.totalorder %s3395_s20, %s2960_s4  ;;  %p2967_p10 = scmp.lt.u32.totalorder %s2960_s4, %s3395_s20 }
   0xd   : > { %s3407_s3 = scalar_select %p3126_p2, 1, 0 }
   0xe   : > { %p2908_p4 = pneg %p3126_p2 }
  0x10   : > { %p3135_p5 = pnand %p3399_p3, %p2908_p4 }
  0x12   : > { %p2962_p7 = pneg %p3135_p5 }
  0x14   : > { %p2963_p8 = pnand %p2962_p7, %p2961_p6 }
  0x16   : > { %p2964_p9 = pneg %p2963_p8 }
  0x18   : > { %p2969_p11 = pnand %p2967_p10, %p2964_p9 }
  0x1a   : > { %2972 = shalt.err (!%p2969_p11)
}
  0x1b   : > { %s2973_s1 = scalar_lea.vmem %s585_s27, 16384  ;;  %p2981_p1 = scmp.lt.s32.totalorder %s585_s27, %s585_s27 }
  0x1c   : > { %p2974_p12 = scmp.ne.s32.totalorder %s585_s27, %s2973_s1  ;;  %p2982_p4 = scmp.lt.s32.totalorder %s2973_s1, %s2973_s1 }
  0x1e   : > { %p2976_p13 = pnand %p2974_p12, %p2962_p7  ;;  %p2983_p3 = por %p2982_p4, %p2981_p1 }
  0x20   : > { %p2977_p0 = pneg %p2976_p13 }
  0x22   : > { %p2984_p2 = pnand %p2983_p3, %p2977_p0 }
  0x24   : > { %2987 = shalt.err (!%p2984_p2)
}
  0x25   : > { %s3001_s24 = smov 512   ;;  %s3002_s26 = smov 32  }
  0x26   : > { %2911 = dma.hbm_to_vmem [thread:$0]  (!%p3135_p5), %s3395_s20, 16384, %s585_s27, [#allocation3], %s3001_s24, %s3001_s24, %s3002_s26  }
  0x27   : > { %p3409_p6 = scmp.ne.s32.totalorder %s3407_s3, 0 }
  0x28   : > { %p3410_p8 = scmp.eq.s32.totalorder (!%p3409_p6), %s3122_s25, 0 }
  0x29   : > { %632 = sbr.rel (%p3409_p6) target bundleno = 1689 (0x699), region = 104 }
  0x30   : > { %2993 = dma.done.wait (%p3410_p8), [#allocation3], 16384   ;;  %p3411_p7 = pmov %p3410_p8 }
  0x31   : > { %p707_p2 = scmp.lt.s32.totalorder %s3122_s25, 1  ;;  %v3003_v0 = vmov 0   ;;  %s3412_s4 = sld [smem:[#allocation5_spill]]  ;;  %vm784_vm0 = vcmask 1043456   ;;  %v2933_v5 = vld [vmem:[%s3384_s9] sm:$0xff]   ;;  %vm903_vm1 = vcmask 130048  }
  0x32   : > { %2995 = vsyncadd (%p3411_p7), [#allocation3], 4294950912  ;;  %823 = vmatprep.mubr.bf16.mxu0 %v3003_v0  ;;  %2928 = vset.pattern.permute.xlu0 %v3003_v0  ;;  %s3413_s23 = sld [smem:[#allocation6_spill]]  ;;  %v2934_v7 = vld [vmem:[%s3382_s7] sm:$0xff]   ;;  %vm777_vm2 = vcmask 64512   ;;  %v2935_v8 = vld [vmem:[%s3384_s9 + $0x8] sm:$0xff]  }
  0x33   : > { %s3419_s25 = smov (!%p707_p2, %s3122_s25), 1  ;;  %2929 = vset.pattern.permute.xlu1 %v3003_v0  ;;  %2858 = vmatprep.mubr.msk.bf16.mxu1 %vm903_vm1, %v2933_v5  ;;  %v863_v9 = vld [vmem:[%s3385_s10] sm:$0xff]  ;;  %v865_v10 = vld [vmem:[%s3385_s10 + $0x10] sm:$0xff]  ;;  %v864_v11 = vld [vmem:[%s3385_s10 + $0x8] sm:$0xff]  ;;  %v3004_v27 = vmov 0.0   ;;  %vm3005_vm3 = vmmov 0  }
  0x34   : > { %s2832_s27 = sshll.u32 %s3419_s25, 3  ;;  %869 = vperm.xlu0 %2928, %v863_v9   ;;  %879 = vperm.xlu1 %2929, %v865_v10   ;;  %v866_v12 = vld [vmem:[%s3385_s10 + $0x18] sm:$0xff]  ;;  %v2936_v13 = vld [vmem:[%s3382_s7 + $0x8] sm:$0xff]   ;;  %v738_v14 = vld [vmem:[%s3383_s8] sm:$0xff]  ;;  %s3414_s3 = sld [smem:[#allocation9_spill]]  ;;  %vm966_vm4 = vcmask 261120  }
  0x35   : > { %v739_v15 = vld [vmem:[%s3383_s8 + $0x8] sm:$0xff]  ;;  %v740_v16 = vld [vmem:[%s3383_s8 + $0x10] sm:$0xff]  ;;  %v741_v17 = vld [vmem:[%s3383_s8 + $0x18] sm:$0xff]  ;;  %s2903_s22 = smul.u32 12, %s3419_s25  ;;  %s3415_s24 = sld [smem:[#allocation7_spill]]  ;;  %vm1059_vm5 = vcmask 523264  }
  0x36   : > { %v1155_v18 = vld [vmem:[%s3387_s12] sm:$0xff]  ;;  %v1156_v19 = vld [vmem:[%s3387_s12 + $0x8] sm:$0xff]  ;;  %v1157_v20 = vld [vmem:[%s3387_s12 + $0x10] sm:$0xff]  ;;  %vm1198_vm6 = vcmask 195584   ;;  %s2834_s5 = sshll.u32 %s3419_s25, 4  ;;  %s3417_s0 = sld [smem:[#allocation10_spill]] }
  0x37   : > { %s711_s30 = scalar_lea.vmem %s3412_s4, %s2832_s27  ;;  %v1158_v21 = vld [vmem:[%s3387_s12 + $0x18] sm:$0xff]  ;;  %v1374_v22 = vld [vmem:[%s3389_s14] sm:$0xff]  ;;  %v1375_v23 = vld [vmem:[%s3389_s14 + $0x8] sm:$0xff]  ;;  %vm1540_vm7 = vcmask 1041408   ;;  %vm1536_vm8 = vcmask 31744   ;;  %s2835_s28 = sshll.u32 %s3419_s25, 6 }
  0x38   : > { %s716_s1 = scalar_lea.vmem %s3413_s23, %s2832_s27  ;;  %v733_v1 = vld [vmem:[%s711_s30] sm:$0xff]  ;;  %874 = vperm.xlu0 %2928, %v864_v11   ;;  %884 = vperm.xlu1 %2929, %v866_v12   ;;  %v1376_v24 = vld [vmem:[%s3389_s14 + $0x10] sm:$0xff]  ;;  %v1377_v25 = vld [vmem:[%s3389_s14 + $0x18] sm:$0xff] }
  0x39   : > { %v2662_v2 = vcombine.high %v733_v1, %v733_v1  ;;  %v2931_v3 = vld [vmem:[%s716_s1] sm:$0xff]   ;;  %v2661_v4 = vcombine.low %v733_v1, %v733_v1  ;;  %s3416_s1 = sld [smem:[#allocation8_spill]] }
  0x3a   : > { %2856 = vmatprep.subr.bf16.mxu1 %v2931_v3  ;;  %v1590_v26 = vld [vmem:[%s3394_s19] sm:$0x1f]  ;;  %v2942_v30 = vld [vmem:[%s3414_s3 + $0x14] ss:$8 sps:$4 sm:$0xff]   ;;  %v2940_v31 = vld [vmem:[%s3414_s3 + $0x10] ss:$8 sps:$4 sm:$0xff]  }
  0x3b   : > { %2663 = vmatprep.subr.msk.bf16.mxu0 %vm784_vm0, %v2662_v2  ;;  %v786_v6 = vsel %vm784_vm0, %v2661_v4, 0  ;;  %2857 = vmatpush3.bf16.msra.mxu1 %v2931_v3  ;;  %v2937_v28 = vld [vmem:[%s3414_s3] ss:$8 sps:$4 sm:$0xff]   ;;  %v2939_v29 = vld [vmem:[%s3414_s3 + $0x4] ss:$8 sps:$4 sm:$0xff]   ;;  %s721_s26 = scalar_lea.vmem %s3415_s24, %s2903_s22 }
  0x3c   : > { %792 = vmatpush1.bf16.msra.mxu0 %v786_v6  ;;  %744 = vperm.xlu0 %2928, %v738_v14   ;;  %v2945_v32 = vld [vmem:[%s3414_s3 + $0x24] ss:$8 sps:$4 sm:$0xff]   ;;  %v2943_v33 = vld [vmem:[%s3414_s3 + $0x20] ss:$8 sps:$4 sm:$0xff]   ;;  %v2948_v34 = vld [vmem:[%s3414_s3 + $0x34] ss:$8 sps:$4 sm:$0xff]  }
  0x3d   : > { %749 = vperm.xlu1 %2929, %v739_v15   ;;  %2862 = vmatprep.subr.bf16.mxu1 %v3004_v27  ;;  %v2946_v35 = vld [vmem:[%s3414_s3 + $0x30] ss:$8 sps:$4 sm:$0xff]  }
  0x3e   : > { %2859 = vmatmul.mubr.msk.bf16.vlgmr.msra.gmra.mrb[0].mxu1 %vm903_vm1, %v2935_v8  ;;  %1063 = vmatprep.subr.bf16.mxu0 %v2939_v29 }
  0x3f   : > { %2664 = vmatmul.mubr.msk.bf16.vlgmr.msra.gmra.mrb[0].mxu0 %vm777_vm2, %v2934_v7  ;;  %2866 = vmatprep.mubr.msk.bf16.mxu1 %vm3005_vm3, %v3004_v27  ;;  %s3303_s24 = scalar_lea.vmem %s3416_s1, %s2834_s5  ;;  %s731_s5 = scalar_lea.vmem %s3396_s21, %s2835_s28 }
  0x40   : > { %833 = vmatprep.mubr.bf16.mxu0 %v3003_v0  ;;  %754 = vperm.xlu0 %2928, %v740_v16  }
  0x41   : > { %759 = vperm.xlu1 %2929, %v741_v17   ;;  %1064 = vmatpush1.bf16.msra.mxu0 %v2937_v28  ;;  %v2951_v28 = vld [vmem:[%s3386_s11] sm:$0xff]  }
  0x42   : > { %1065 = vmatprep.subr.bf16.mxu0 %v2942_v30 }
  0x44   : > { %1161 = vperm.xlu0 %2928, %v1155_v18  }
  0x45   : > { %1166 = vperm.xlu1 %2929, %v1156_v19   ;;  %1066 = vmatpush1.bf16.msra.mxu0 %v2940_v31  ;;  %v2950_v31 = vld [vmem:[%s721_s26 + $0x8] ss:$0 sps:$4 sm:$0xff]  }
  0x46   : > { %1067 = vmatprep.subr.bf16.mxu0 %v2945_v32 }
  0x47   : > { %2665 = vmatmul.mubr.msk.bf16.gmra.mrb[4].mxu0 %vm777_vm2, %v2936_v13 }
  0x48   : > { %1095 = vmatprep.mubr.bf16.mxu0 %v3003_v0  ;;  %1171 = vperm.xlu0 %2928, %v1157_v20  }
  0x49   : > { %1176 = vperm.xlu1 %2929, %v1158_v21   ;;  %1068 = vmatpush1.bf16.msra.mxu0 %v2943_v33  ;;  %v965_v21 = vld [vmem:[%s3391_s16] sm:$0x7] }
  0x4a   : > { %1069 = vmatprep.subr.bf16.mxu0 %v2948_v34  ;;  %v1206_v34 = vsel %vm784_vm0, %v2950_v31, 0 }
  0x4c   : > { %1380 = vperm.xlu0 %2928, %v1374_v22  }
  0x4d   : > { %1385 = vperm.xlu1 %2929, %v1375_v23   ;;  %1070 = vmatpush1.bf16.msra.mxu0 %v2946_v35  ;;  %v2952_v35 = vld [vmem:[%s3386_s11 + $0x8] sm:$0xff]  }
  0x50   : > { %1390 = vperm.xlu0 %2928, %v1376_v24   ;;  %v2949_v24 = vld [vmem:[%s721_s26] sm:$0xff]  }
  0x51   : > { %1395 = vperm.xlu1 %2929, %v1377_v25   ;;  %v856_v25 = vld [vmem:[%s3390_s15] sm:$0x7]  ;;  %2870 = vmatprep.subr.bf16.mxu0 %v2949_v24 }
  0x54   : > { %1593 = vperm.xlu0 %2928, %v1590_v26  }
  0xb3   : > { %v870_v36 = vpop.permute.xlu0 %869  ;;  %v880_v37 = vpop.permute.xlu1 %879 }
  0xb7   : > { %v875_v38 = vpop.permute.xlu0 %874  ;;  %v885_v39 = vpop.permute.xlu1 %884 }
  0xbb   : > { %v745_v40 = vpop.permute.xlu0 %744 }
  0xbc   : > { %v750_v41 = vpop.permute.xlu1 %749 }
  0xbf   : > { %v755_v5 = vpop.permute.xlu0 %754 }
  0xc0   : > { %v760_v11 = vpop.permute.xlu1 %759 }
 0x111   : > { %v2860_v43 = vpop.f32.mrb[0].mxu1 }
 0x112   : > { %v825_v42 = vpop.f32.mrb[0].mxu0  ;;  %v953_v45 = vadd.f32 %v2860_v43, %v880_v37  ;;  %v944_v47 = vpop.f32.mrb[1].mxu1 }
 0x113   : > { %v826_v44 = vadd.f32 %v825_v42, %v745_v40  ;;  %v827_v46 = vpop.f32.mrb[1].mxu0  ;;  %v945_v49 = vadd.f32 %v944_v47, %v870_v36  ;;  %v2861_v51 = vpop.f32.mrb[2].mxu1 }
 0x114   : > { %v828_v48 = vadd.f32 %v827_v46, %v745_v40  ;;  %v829_v50 = vpop.f32.mrb[2].mxu0  ;;  %v956_v53 = vadd.f32 %v2861_v51, %v885_v39  ;;  %v947_v54 = vpop.f32.mrb[3].mxu1  ;;  %v961_v59 = vmax.f32 %v953_v45, 0.0  ;;  %v2957_v40 = vld [vmem:[%s3417_s0] ss:$8 sps:$4 sm:$0xff]  }
 0x115   : > { %v830_v52 = vadd.f32 %v829_v50, %v750_v41  ;;  %v831_v55 = vpop.f32.mrb[3].mxu0  ;;  %v948_v56 = vadd.f32 %v947_v54, %v875_v38  ;;  %v844_v58 = vmax.f32 %v826_v44, 0.0  ;;  %v959_v63 = vmax.f32 %v945_v49, 0.0  ;;  %v1162_v45 = vpop.permute.xlu0 %1161 }
 0x116   : > { %v832_v57 = vadd.f32 %v831_v55, %v750_v41  ;;  %v962_v61 = vmax.f32 %v956_v53, 0.0  ;;  %v845_v62 = vmax.f32 %v828_v48, 0.0  ;;  %v2959_v41 = vld [vmem:[%s3417_s0 + $0x4] ss:$8 sps:$4 sm:$0xff]   ;;  %v1167_v49 = vpop.permute.xlu1 %1166 }
 0x117   : > { %v846_v60 = vmax.f32 %v830_v52, 0.0  ;;  %v960_v1 = vmax.f32 %v948_v56, 0.0 }
 0x118   : > { %v847_v2 = vmax.f32 %v832_v57, 0.0  ;;  %v964_v4 = vpack.c.bf16 %v962_v61, %v961_v59 }
 0x119   : > { %v852_v3 = vpack.c.bf16 %v846_v60, %v844_v58  ;;  %v963_v6 = vpack.c.bf16 %v960_v1, %v959_v63  ;;  %v1172_v50 = vpop.permute.xlu0 %1171 }
 0x11a   : > { %v853_v7 = vpack.c.bf16 %v847_v2, %v845_v62  ;;  %v835_v8 = vpop.f32.mrb[4].mxu0  ;;  %v1177_v54 = vpop.permute.xlu1 %1176 }
 0x11b   : > { %v836_v9 = vadd.f32 %v835_v8, %v755_v5  ;;  %v837_v10 = vpop.f32.mrb[5].mxu0  ;;  %2863 = vmatpush3.bf16.msra.mxu1 %v963_v6  ;;  %v2954_v6 = vld [vmem:[%s3303_s24 + $0x8] sm:$0xff]  }
 0x11c   : > { %v838_v12 = vadd.f32 %v837_v10, %v755_v5  ;;  %v839_v13 = vpop.f32.mrb[6].mxu0  ;;  %2864 = vmatprep.subr.bf16.mxu1 %v3004_v27  ;;  %v2955_v5 = vld [vmem:[%s3388_s13] sm:$0xff]  }
 0x11d   : > { %v840_v14 = vadd.f32 %v839_v13, %v760_v11  ;;  %v841_v15 = vpop.f32.mrb[7].mxu0  ;;  %v848_v17 = vmax.f32 %v836_v9, 0.0 }
 0x11e   : > { %v842_v16 = vadd.f32 %v841_v15, %v760_v11  ;;  %v849_v19 = vmax.f32 %v838_v12, 0.0  ;;  %v1381_v11 = vpop.permute.xlu0 %1380 }
 0x11f   : > { %v850_v18 = vmax.f32 %v840_v14, 0.0  ;;  %2865 = vmatpush3.bf16.msra.mxu1 %v964_v4  ;;  %v1263_v4 = vld [vmem:[%s3392_s17] sm:$0x7]  ;;  %v1386_v14 = vpop.permute.xlu1 %1385 }
 0x120   : > { %v851_v20 = vmax.f32 %v842_v16, 0.0  ;;  %1107 = vmatprep.subr.bf16.mxu1 %v853_v7  ;;  %v2956_v7 = vld [vmem:[%s3388_s13 + $0x8] sm:$0xff]  }
 0x121   : > { %v854_v22 = vpack.c.bf16 %v850_v18, %v848_v17 }
 0x122   : > { %v855_v23 = vpack.c.bf16 %v851_v20, %v849_v19  ;;  %2867 = vmatmul.mubr.msk.bf16.vlgmr.msra.gmra.mrb[4].mxu1 %vm966_vm4, %v965_v21  ;;  %v1391_v15 = vpop.permute.xlu0 %1390 }
 0x123   : > { %1108 = vmatpush1.bf16.msra.mxu1 %v852_v3  ;;  %1139 = vmatprep.mubr.bf16.mxu1 %v3003_v0  ;;  %v2953_v3 = vld [vmem:[%s3303_s24] sm:$0xff]   ;;  %v1396_v19 = vpop.permute.xlu1 %1395 }
 0x124   : > { %1109 = vmatprep.subr.bf16.mxu1 %v855_v23 }
 0x127   : > { %1110 = vmatpush1.bf16.msra.mxu1 %v854_v22 }
 0x128   : > { %2878 = vmatprep.subr.bf16.mxu1 %v3004_v27 }
 0x12a   : > { %2681 = vmatmul.mubr.msk.bf16.vlgmr.msra.gmra.mrb[8].mxu1 %vm966_vm4, %v856_v25 }
 0x12b   : > { %2882 = vmatprep.mubr.msk.bf16.mxu1 %vm3005_vm3, %v3004_v27 }
 0x1f5   : > { %v1004_v26 = vpop.f32.mrb[4].mxu1 }
 0x1f6   : > { %v1010_v29 = vpack.c.bf16 %v1004_v26, %v1004_v26  ;;  %v2868_v30 = vpop.f32.mrb[5].mxu1 }
 0x1f7   : > { %v1007_v32 = vpop.f32.mrb[6].mxu1 }
 0x1f8   : > { %v2869_v33 = vpop.f32.mrb[7].mxu1  ;;  %2680 = vmatmul.mubr.msk.bf16.vlgmr.msra.gmra.mrb[8].mxu0 %vm1059_vm5, %v1010_v29  ;;  %v2699_v32 = vld.sshfl [vmem:[%s3381_s6] sm:$0x33 pattern:$0x76325410] }
 0x1f9   : > { %2871 = vmatpush3.bf16.msra.mxu0 %v2949_v24  ;;  %2874 = vmatprep.mubr.msk.bf16.mxu0 %vm1198_vm6, %v2951_v28  ;;  %v1535_v33 = vcombine.high %v2699_v32, %v2699_v32 }
 0x1fa   : > { %2902 = vmatprep.subr.msk.bf16.mxu0 %vm784_vm0, %v2950_v31  ;;  %v1481_v31 = vld [vmem:[%s3393_s18] sm:$0x7] }
 0x1fd   : > { %2873 = vmatpush3.bf16.msra.mxu0 %v1206_v34  ;;  %v1141_v36 = vpop.f32.mrb[8].mxu1  ;;  %v1542_v34 = vsel %vm1540_vm7, %v2699_v32, 0 }
 0x1fe   : > { %v1143_v37 = vpop.f32.mrb[9].mxu1  ;;  %1323 = vmatprep.subr.bf16.mxu0 %v2959_v41  ;;  %v1612_v41 = vld [vmem:[#allocation2 + $0x60] sm:$0xff] }
 0x1ff   : > { %v1145_v38 = vpop.f32.mrb[10].mxu1 }
 0x200   : > { %2875 = vmatmul.mubr.msk.bf16.vlgmr.msra.gmra.mrb[12].mxu0 %vm1198_vm6, %v2952_v35  ;;  %v1146_v39 = vpop.f32.mrb[11].mxu1  ;;  %v1600_v35 = vld [vmem:[#allocation2] sm:$0xff] }
 0x201   : > { %1355 = vmatprep.mubr.bf16.mxu0 %v3003_v0  ;;  %1324 = vmatpush1.bf16.msra.mxu0 %v2957_v40  ;;  %v3345_v39 = vld [vmem:[#allocation2 + $0x28] sm:$0xff]  ;;  %v1608_v40 = vld [vmem:[#allocation2 + $0x40] sm:$0xff] }
 0x202   : > { %2894 = vmatprep.subr.bf16.mxu0 %v3004_v27 }
 0x2cb   : > { %v1097_v42 = vpop.f32.mrb[8].mxu0 }
 0x2cc   : > { %v3312_v43 = vadd.f32 %v1141_v36, %v1097_v42  ;;  %v1099_v44 = vpop.f32.mrb[9].mxu0  ;;  %v1604_v36 = vld [vmem:[#allocation2 + $0x20] sm:$0xff] }
 0x2cd   : > { %v3314_v46 = vadd.f32 %v1143_v37, %v1099_v44  ;;  %v1101_v47 = vpop.f32.mrb[10].mxu0  ;;  %v3343_v37 = vld [vmem:[#allocation2 + $0x8] sm:$0xff]  ;;  %v2703_v38 = vcombine.high %v1600_v35, %v1604_v36 }
 0x2ce   : > { %v1102_v48 = vpop.f32.mrb[11].mxu0  ;;  %v2704_v42 = vcombine.low %v3343_v37, %v3345_v39  ;;  %v2705_v44 = vcombine.high %v3343_v37, %v3345_v39  ;;  %v2710_v47 = vcombine.low %v1608_v40, %v1612_v41 }
 0x2cf   : > { %v1616_v48 = vld [vmem:[#allocation2 + $0x80] sm:$0xff] }
 0x2d3   : > { %v2876_v51 = vpop.f32.mrb[12].mxu0 }
 0x2d4   : > { %v1251_v52 = vadd.f32 %v2876_v51, %v1172_v50  ;;  %v1242_v53 = vpop.f32.mrb[13].mxu0 }
 0x2d5   : > { %v1243_v55 = vadd.f32 %v1242_v53, %v1162_v45  ;;  %v2877_v56 = vpop.f32.mrb[14].mxu0  ;;  %v2711_v45 = vcombine.high %v1608_v40, %v1612_v41  ;;  %v1628_v53 = vld [vmem:[#allocation2 + $0xe0] sm:$0xff]  ;;  %v1609_v40 = vld [vmem:[#allocation2 + $0x48] sm:$0xff] }
 0x2d6   : > { %v1254_v57 = vadd.f32 %v2877_v56, %v1177_v54  ;;  %v1245_v58 = vpop.f32.mrb[15].mxu0  ;;  %v1259_v60 = vmax.f32 %v1251_v52, 0.0  ;;  %v1624_v52 = vld [vmem:[#allocation2 + $0xc0] sm:$0xff]  ;;  %v1613_v41 = vld [vmem:[#allocation2 + $0x68] sm:$0xff] }
 0x2d7   : > { %v1246_v59 = vadd.f32 %v1245_v58, %v1167_v49  ;;  %v1257_v62 = vmax.f32 %v1243_v55, 0.0  ;;  %v1620_v49 = vld [vmem:[#allocation2 + $0xa0] sm:$0xff]  ;;  %v2727_v54 = vcombine.high %v1624_v52, %v1628_v53  ;;  %v2726_v55 = vcombine.low %v1624_v52, %v1628_v53  ;;  %v1625_v53 = vld [vmem:[#allocation2 + $0xc8] sm:$0xff] }
 0x2d8   : > { %v1260_v61 = vmax.f32 %v1254_v57, 0.0  ;;  %v2719_v50 = vcombine.high %v1616_v48, %v1620_v49  ;;  %v2718_v51 = vcombine.low %v1616_v48, %v1620_v49  ;;  %v1632_v56 = vld [vmem:[#allocation2 + $0x100] sm:$0xff]  ;;  %v2713_v48 = vcombine.high %v1609_v40, %v1613_v41 }
 0x2d9   : > { %v1258_v63 = vmax.f32 %v1246_v59, 0.0  ;;  %v1636_v57 = vld [vmem:[#allocation2 + $0x120] sm:$0xff] }
 0x2da   : > { %v1262_v1 = vpack.c.bf16 %v1260_v61, %v1259_v60  ;;  %v2735_v58 = vcombine.high %v1632_v56, %v1636_v57  ;;  %v2734_v59 = vcombine.low %v1632_v56, %v1636_v57  ;;  %v1640_v60 = vld [vmem:[#allocation2 + $0x140] sm:$0xff]  ;;  %v1633_v57 = vld [vmem:[#allocation2 + $0x108] sm:$0xff] }
 0x2db   : > { %v1261_v2 = vpack.c.bf16 %v1258_v63, %v1257_v62  ;;  %v1644_v61 = vld [vmem:[#allocation2 + $0x160] sm:$0xff] }
 0x2dc   : > { %v2743_v62 = vcombine.high %v1640_v60, %v1644_v61  ;;  %v2742_v63 = vcombine.low %v1640_v60, %v1644_v61  ;;  %v1641_v61 = vld [vmem:[#allocation2 + $0x148] sm:$0xff] }
 0x2dd   : > { %2879 = vmatpush3.bf16.msra.mxu1 %v1261_v2  ;;  %v1652_v2 = vld [vmem:[#allocation2 + $0x1a0] sm:$0xff] }
 0x2de   : > { %2880 = vmatprep.subr.bf16.mxu1 %v3004_v27 }
 0x2e1   : > { %2881 = vmatpush3.bf16.msra.mxu1 %v1262_v1  ;;  %v1648_v1 = vld [vmem:[#allocation2 + $0x180] sm:$0xff] }
 0x2e2   : > { %2886 = vmatprep.subr.bf16.mxu1 %v2953_v3 }
 0x2e4   : > { %2883 = vmatmul.mubr.msk.bf16.vlgmr.msra.gmra.mrb[12].mxu1 %vm966_vm4, %v1263_v4  ;;  %v2750_v4 = vcombine.low %v1648_v1, %v1652_v2 }
 0x2e5   : > { %2887 = vmatpush3.bf16.msra.mxu1 %v2953_v3  ;;  %2890 = vmatprep.mubr.msk.bf16.mxu1 %vm966_vm4, %v2955_v5  ;;  %v2751_v3 = vcombine.high %v1648_v1, %v1652_v2  ;;  %v1656_v5 = vld [vmem:[#allocation2 + $0x1c0] sm:$0xff] }
 0x2e6   : > { %2888 = vmatprep.subr.bf16.mxu1 %v2954_v6 }
 0x2e9   : > { %2889 = vmatpush3.bf16.msra.mxu1 %v2954_v6  ;;  %v1660_v6 = vld [vmem:[#allocation2 + $0x1e0] sm:$0xff] }
 0x2ea   : > { %2700 = vmatprep.subr.msk.bf16.mxu1 %vm1540_vm7, %v1535_v33 }
 0x2ec   : > { %2891 = vmatmul.mubr.msk.bf16.vlgmr.msra.gmra.mrb[16].mxu1 %vm966_vm4, %v2956_v7  ;;  %v2759_v7 = vcombine.high %v1656_v5, %v1660_v6 }
 0x2ed   : > { %1579 = vmatprep.mubr.bf16.mxu1 %v3003_v0  ;;  %1548 = vmatpush1.bf16.msra.mxu1 %v1542_v34 }
 0x2ee   : > { %2409 = vmatprep.subr.bf16.mxu1 %v2705_v44 }
 0x3b7   : > { %v1301_v8 = vpop.f32.mrb[12].mxu1 }
 0x3b8   : > { %v1307_v9 = vpack.c.bf16 %v1301_v8, %v1301_v8  ;;  %v2884_v10 = vpop.f32.mrb[13].mxu1  ;;  %v2758_v8 = vcombine.low %v1656_v5, %v1660_v6 }
 0x3b9   : > { %v1304_v12 = vpop.f32.mrb[14].mxu1  ;;  %v1668_v10 = vld [vmem:[#allocation2 + $0x220] sm:$0xff] }
 0x3ba   : > { %v2885_v13 = vpop.f32.mrb[15].mxu1  ;;  %2691 = vmatmul.mubr.msk.bf16.vlgmr.msra.gmra.mrb[16].mxu0 %vm903_vm1, %v1307_v9  ;;  %v1664_v9 = vld [vmem:[#allocation2 + $0x200] sm:$0xff] }
 0x3bb   : > { %2898 = vmatprep.mubr.msk.bf16.mxu0 %vm3005_vm3, %v3004_v27  ;;  %v2766_v12 = vcombine.low %v1664_v9, %v1668_v10  ;;  %v1672_v13 = vld [vmem:[#allocation2 + $0x240] sm:$0xff] }
 0x3bf   : > { %v2892_v16 = vpop.f32.mrb[16].mxu1 }
 0x3c0   : > { %v1469_v17 = vadd.f32 %v2892_v16, %v1391_v15  ;;  %v1460_v18 = vpop.f32.mrb[17].mxu1 }
 0x3c1   : > { %v1461_v20 = vadd.f32 %v1460_v18, %v1381_v11  ;;  %v2893_v21 = vpop.f32.mrb[18].mxu1  ;;  %v2767_v11 = vcombine.high %v1664_v9, %v1668_v10  ;;  %v1684_v18 = vld [vmem:[#allocation2 + $0x2a0] sm:$0xff] }
 0x3c2   : > { %v1472_v0 = vadd.f32 %v2893_v21, %v1396_v19  ;;  %v1463_v22 = vpop.f32.mrb[19].mxu1  ;;  %v1477_v24 = vmax.f32 %v1469_v17, 0.0  ;;  %v1680_v17 = vld [vmem:[#allocation2 + $0x280] sm:$0xff] }
 0x3c3   : > { %v1464_v23 = vadd.f32 %v1463_v22, %v1386_v14  ;;  %v1475_v26 = vmax.f32 %v1461_v20, 0.0  ;;  %v1676_v14 = vld [vmem:[#allocation2 + $0x260] sm:$0xff]  ;;  %v2783_v19 = vcombine.high %v1680_v17, %v1684_v18  ;;  %v2782_v20 = vcombine.low %v1680_v17, %v1684_v18 }
 0x3c4   : > { %v1478_v25 = vmax.f32 %v1472_v0, 0.0  ;;  %v2775_v15 = vcombine.high %v1672_v13, %v1676_v14  ;;  %v2774_v16 = vcombine.low %v1672_v13, %v1676_v14  ;;  %v1688_v21 = vld [vmem:[#allocation2 + $0x2c0] sm:$0xff] }
 0x3c5   : > { %v1476_v28 = vmax.f32 %v1464_v23, 0.0  ;;  %v1692_v0 = vld [vmem:[#allocation2 + $0x2e0] sm:$0xff] }
 0x3c6   : > { %v1480_v29 = vpack.c.bf16 %v1478_v25, %v1477_v24  ;;  %v2791_v22 = vcombine.high %v1688_v21, %v1692_v0  ;;  %v2790_v23 = vcombine.low %v1688_v21, %v1692_v0  ;;  %v1696_v24 = vld [vmem:[#allocation2 + $0x300] sm:$0xff] }
 0x3c7   : > { %v1479_v30 = vpack.c.bf16 %v1476_v28, %v1475_v26  ;;  %v1700_v25 = vld [vmem:[#allocation2 + $0x320] sm:$0xff] }
 0x3c8   : > { %v2799_v26 = vcombine.high %v1696_v24, %v1700_v25  ;;  %v2798_v28 = vcombine.low %v1696_v24, %v1700_v25 }
 0x3c9   : > { %2895 = vmatpush3.bf16.msra.mxu0 %v1479_v30  ;;  %v1708_v30 = vld [vmem:[#allocation2 + $0x360] sm:$0xff] }
 0x3ca   : > { %2896 = vmatprep.subr.bf16.mxu0 %v3004_v27  ;;  %v2702_v27 = vcombine.low %v1600_v35, %v1604_v36 }
 0x3cd   : > { %2897 = vmatpush3.bf16.msra.mxu0 %v1480_v29  ;;  %v1704_v29 = vld [vmem:[#allocation2 + $0x340] sm:$0xff] }
 0x3ce   : > { %2368 = vmatprep.subr.bf16.mxu0 %v2703_v38  ;;  %v2806_v32 = vcombine.low %v1704_v29, %v1708_v30 }
 0x3d0   : > { %2899 = vmatmul.mubr.msk.bf16.vlgmr.msra.gmra.mrb[20].mxu0 %vm966_vm4, %v1481_v31  ;;  %v2807_v31 = vcombine.high %v1704_v29, %v1708_v30 }
 0x3d1   : > { %2369 = vmatpush1.bf16.msra.mxu0 %v2702_v27 }
 0x3d2   : > { %2370 = vmatprep.subr.bf16.mxu0 %v2711_v45 }
 0x3d5   : > { %2371 = vmatpush1.bf16.msra.mxu0 %v2710_v47 }
 0x3d6   : > { %2372 = vmatprep.subr.bf16.mxu0 %v2719_v50  ;;  %v1617_v50 = vld [vmem:[#allocation2 + $0x88] sm:$0xff] }
 0x3d9   : > { %2373 = vmatpush1.bf16.msra.mxu0 %v2718_v51  ;;  %v1621_v51 = vld [vmem:[#allocation2 + $0xa8] sm:$0xff] }
 0x3da   : > { %2374 = vmatprep.subr.bf16.mxu0 %v2727_v54  ;;  %v1629_v54 = vld [vmem:[#allocation2 + $0xe8] sm:$0xff] }
 0x3db   : > { %v2729_v56 = vcombine.high %v1625_v53, %v1629_v54 }
 0x3dd   : > { %2375 = vmatpush1.bf16.msra.mxu0 %v2726_v55  ;;  %v2720_v55 = vcombine.low %v1617_v50, %v1621_v51 }
 0x3de   : > { %2376 = vmatprep.subr.bf16.mxu0 %v2735_v58  ;;  %v1637_v58 = vld [vmem:[#allocation2 + $0x128] sm:$0xff] }
 0x3df   : > { %v2737_v60 = vcombine.high %v1633_v57, %v1637_v58  ;;  %v2736_v37 = vcombine.low %v1633_v57, %v1637_v58 }
 0x3e1   : > { %2377 = vmatpush1.bf16.msra.mxu0 %v2734_v59  ;;  %v2728_v59 = vcombine.low %v1625_v53, %v1629_v54  ;;  %v1606_v53 = vld [vmem:[#allocation2 + $0x30] sm:$0xff]  ;;  %v1603_v54 = vld [vmem:[#allocation2 + $0x18] sm:$0xff] }
 0x3e2   : > { %2378 = vmatprep.subr.bf16.mxu0 %v2743_v62  ;;  %v1645_v62 = vld [vmem:[#allocation2 + $0x168] sm:$0xff] }
 0x3e3   : > { %v2745_v39 = vcombine.high %v1641_v61, %v1645_v62  ;;  %v2744_v1 = vcombine.low %v1641_v61, %v1645_v62 }
 0x3e5   : > { %2379 = vmatpush1.bf16.msra.mxu0 %v2742_v63  ;;  %v1653_v63 = vld [vmem:[#allocation2 + $0x1a8] sm:$0xff] }
 0x3e6   : > { %2380 = vmatprep.subr.bf16.mxu0 %v2751_v3  ;;  %v1657_v3 = vld [vmem:[#allocation2 + $0x1c8] sm:$0xff] }
 0x3e9   : > { %2381 = vmatpush1.bf16.msra.mxu0 %v2750_v4  ;;  %v1661_v4 = vld [vmem:[#allocation2 + $0x1e8] sm:$0xff] }
 0x3ea   : > { %2382 = vmatprep.subr.bf16.mxu0 %v2759_v7  ;;  %v2761_v6 = vcombine.high %v1657_v3, %v1661_v4  ;;  %v1665_v7 = vld [vmem:[#allocation2 + $0x208] sm:$0xff]  ;;  %v2760_v9 = vcombine.low %v1657_v3, %v1661_v4  ;;  %v1610_v3 = vld [vmem:[#allocation2 + $0x50] sm:$0xff] }
 0x3eb   : > { %v1614_v4 = vld [vmem:[#allocation2 + $0x70] sm:$0xff] }
 0x3ed   : > { %2383 = vmatpush1.bf16.msra.mxu0 %v2758_v8  ;;  %v1669_v8 = vld [vmem:[#allocation2 + $0x228] sm:$0xff] }
 0x3ee   : > { %2384 = vmatprep.subr.bf16.mxu0 %v2767_v11  ;;  %v2769_v10 = vcombine.high %v1665_v7, %v1669_v8  ;;  %v1673_v11 = vld [vmem:[#allocation2 + $0x248] sm:$0xff]  ;;  %v2768_v13 = vcombine.low %v1665_v7, %v1669_v8 }
 0x3f1   : > { %2385 = vmatpush1.bf16.msra.mxu0 %v2766_v12  ;;  %v1677_v12 = vld [vmem:[#allocation2 + $0x268] sm:$0xff] }
 0x3f2   : > { %2386 = vmatprep.subr.bf16.mxu0 %v2775_v15  ;;  %v2777_v14 = vcombine.high %v1673_v11, %v1677_v12  ;;  %v1681_v15 = vld [vmem:[#allocation2 + $0x288] sm:$0xff]  ;;  %v2776_v17 = vcombine.low %v1673_v11, %v1677_v12  ;;  %v1622_v11 = vld [vmem:[#allocation2 + $0xb0] sm:$0xff]  ;;  %v1619_v12 = vld [vmem:[#allocation2 + $0x98] sm:$0xff] }
 0x3f5   : > { %2387 = vmatpush1.bf16.msra.mxu0 %v2774_v16  ;;  %v1685_v16 = vld [vmem:[#allocation2 + $0x2a8] sm:$0xff] }
 0x3f6   : > { %2388 = vmatprep.subr.bf16.mxu0 %v2783_v19  ;;  %v2785_v18 = vcombine.high %v1681_v15, %v1685_v16  ;;  %v1689_v19 = vld [vmem:[#allocation2 + $0x2c8] sm:$0xff]  ;;  %v2784_v21 = vcombine.low %v1681_v15, %v1685_v16 }
 0x3f9   : > { %2389 = vmatpush1.bf16.msra.mxu0 %v2782_v20  ;;  %v1693_v20 = vld [vmem:[#allocation2 + $0x2e8] sm:$0xff] }
 0x3fa   : > { %2390 = vmatprep.subr.bf16.mxu0 %v2791_v22  ;;  %v2793_v0 = vcombine.high %v1689_v19, %v1693_v20  ;;  %v1697_v22 = vld [vmem:[#allocation2 + $0x308] sm:$0xff]  ;;  %v2792_v24 = vcombine.low %v1689_v19, %v1693_v20  ;;  %v1627_v19 = vld [vmem:[#allocation2 + $0xd8] sm:$0xff] }
 0x3fb   : > { %v1631_v20 = vld [vmem:[#allocation2 + $0xf8] sm:$0xff] }
 0x3fd   : > { %2391 = vmatpush1.bf16.msra.mxu0 %v2790_v23  ;;  %v1701_v23 = vld [vmem:[#allocation2 + $0x328] sm:$0xff] }
 0x3fe   : > { %2392 = vmatprep.subr.bf16.mxu0 %v2799_v26  ;;  %v2801_v25 = vcombine.high %v1697_v22, %v1701_v23  ;;  %v1705_v26 = vld [vmem:[#allocation2 + $0x348] sm:$0xff]  ;;  %v2800_v29 = vcombine.low %v1697_v22, %v1701_v23  ;;  %v2733_v23 = vcombine.high %v1627_v19, %v1631_v20 }
 0x401   : > { %2393 = vmatpush1.bf16.msra.mxu0 %v2798_v28  ;;  %v1709_v28 = vld [vmem:[#allocation2 + $0x368] sm:$0xff] }
 0x402   : > { %2394 = vmatprep.subr.bf16.mxu0 %v2807_v31  ;;  %v2809_v30 = vcombine.high %v1705_v26, %v1709_v28  ;;  %v2808_v31 = vcombine.low %v1705_v26, %v1709_v28  ;;  %v1635_v26 = vld [vmem:[#allocation2 + $0x118] sm:$0xff] }
 0x403   : > { %v1639_v28 = vld [vmem:[#allocation2 + $0x138] sm:$0xff] }
 0x405   : > { %2395 = vmatpush1.bf16.msra.mxu0 %v2806_v32  ;;  %v1712_v32 = vld [vmem:[#allocation2 + $0x380] sm:$0xff] }
 0x48d   : > { %v1357_v33 = vpop.f32.mrb[16].mxu0 }
 0x48e   : > { %v3352_v34 = vadd.f32 %v1357_v33, %v3312_v43  ;;  %v1359_v35 = vpop.f32.mrb[17].mxu0  ;;  %v2712_v43 = vcombine.low %v1609_v40, %v1613_v41  ;;  %v1716_v33 = vld [vmem:[#allocation2 + $0x3a0] sm:$0xff] }
 0x48f   : > { %v3355_v36 = vadd.f32 %v1359_v35, %v3314_v46  ;;  %v1361_v27 = vpop.f32.mrb[18].mxu0  ;;  %v2721_v46 = vcombine.high %v1617_v50, %v1621_v51  ;;  %v1713_v35 = vld [vmem:[#allocation2 + $0x388] sm:$0xff]  ;;  %v2814_v40 = vcombine.low %v1712_v32, %v1716_v33 }
 0x490   : > { %v1362_v38 = vpop.f32.mrb[19].mxu0  ;;  %v2815_v27 = vcombine.high %v1712_v32, %v1716_v33  ;;  %v1725_v50 = vld [vmem:[#allocation2 + $0x3e8] sm:$0xff]  ;;  %v2741_v32 = vcombine.high %v1635_v26, %v1639_v28  ;;  %v1642_v33 = vld [vmem:[#allocation2 + $0x150] sm:$0xff] }
 0x491   : > { %v1717_v38 = vld [vmem:[#allocation2 + $0x3a8] sm:$0xff] }
 0x492   : > { %v2816_v41 = vcombine.low %v1713_v35, %v1717_v38  ;;  %2396 = vmatprep.subr.bf16.mxu0 %v2815_v27  ;;  %v1643_v27 = vld [vmem:[#allocation2 + $0x158] sm:$0xff] }
 0x493   : > { %2397 = vmatpush1.bf16.msra.mxu0 %v2814_v40 }
 0x4a3   : > { %v1519_v44 = vpop.f32.mrb[20].mxu0 }
 0x4a4   : > { %v1525_v45 = vpack.c.bf16 %v1519_v44, %v1519_v44  ;;  %v2900_v47 = vpop.f32.mrb[21].mxu0  ;;  %v2817_v44 = vcombine.high %v1713_v35, %v1717_v38  ;;  %v1646_v35 = vld [vmem:[#allocation2 + $0x170] sm:$0xff]  ;;  %v1647_v38 = vld [vmem:[#allocation2 + $0x178] sm:$0xff] }
 0x4a5   : > { %v1522_v49 = vpop.f32.mrb[22].mxu0  ;;  %v1724_v47 = vld [vmem:[#allocation2 + $0x3e0] sm:$0xff] }
 0x4a6   : > { %v2901_v52 = vpop.f32.mrb[23].mxu0  ;;  %2701 = vmatmul.mubr.msk.bf16.vlgmr.msra.gmra.mrb[20].mxu1 %vm1536_vm8, %v1525_v45  ;;  %v1720_v45 = vld [vmem:[#allocation2 + $0x3c0] sm:$0xff] }
 0x4a7   : > { %2410 = vmatpush1.bf16.msra.mxu1 %v2704_v42  ;;  %v1649_v42 = vld [vmem:[#allocation2 + $0x188] sm:$0xff]  ;;  %v2823_v49 = vcombine.high %v1720_v45, %v1724_v47  ;;  %v2822_v51 = vcombine.low %v1720_v45, %v1724_v47  ;;  %v2749_v45 = vcombine.high %v1643_v27, %v1647_v38  ;;  %v1650_v47 = vld [vmem:[#allocation2 + $0x190] sm:$0xff] }
 0x4a8   : > { %2411 = vmatprep.subr.bf16.mxu1 %v2713_v48  ;;  %v2753_v2 = vcombine.high %v1649_v42, %v1653_v63  ;;  %v2752_v5 = vcombine.low %v1649_v42, %v1653_v63  ;;  %v1721_v48 = vld [vmem:[#allocation2 + $0x3c8] sm:$0xff] }
 0x4a9   : > { %v2824_v52 = vcombine.low %v1721_v48, %v1725_v50  ;;  %2398 = vmatprep.subr.bf16.mxu0 %v2823_v49  ;;  %v1651_v49 = vld [vmem:[#allocation2 + $0x198] sm:$0xff] }
 0x4aa   : > { %2399 = vmatpush1.bf16.msra.mxu0 %v2822_v51  ;;  %v2746_v51 = vcombine.low %v1642_v33, %v1646_v35 }
 0x4ab   : > { %2412 = vmatpush1.bf16.msra.mxu1 %v2712_v43  ;;  %v2825_v43 = vcombine.high %v1721_v48, %v1725_v50  ;;  %v1654_v48 = vld [vmem:[#allocation2 + $0x1b0] sm:$0xff]  ;;  %v1655_v50 = vld [vmem:[#allocation2 + $0x1b8] sm:$0xff] }
 0x4ac   : > { %2413 = vmatprep.subr.bf16.mxu1 %v2721_v46  ;;  %v1602_v46 = vld [vmem:[#allocation2 + $0x10] sm:$0xff] }
 0x4ad   : > { %v2706_v57 = vcombine.low %v1602_v46, %v1606_v53 }
 0x4af   : > { %2414 = vmatpush1.bf16.msra.mxu1 %v2720_v55  ;;  %v2707_v55 = vcombine.high %v1602_v46, %v1606_v53  ;;  %v2757_v46 = vcombine.high %v1651_v49, %v1655_v50  ;;  %v1658_v53 = vld [vmem:[#allocation2 + $0x1d0] sm:$0xff] }
 0x4b0   : > { %2415 = vmatprep.subr.bf16.mxu1 %v2729_v56  ;;  %v1607_v56 = vld [vmem:[#allocation2 + $0x38] sm:$0xff] }
 0x4b1   : > { %v2708_v58 = vcombine.low %v1603_v54, %v1607_v56  ;;  %2450 = vmatprep.subr.bf16.mxu0 %v2707_v55  ;;  %v1659_v55 = vld [vmem:[#allocation2 + $0x1d8] sm:$0xff] }
 0x4b3   : > { %2416 = vmatpush1.bf16.msra.mxu1 %v2728_v59  ;;  %v2709_v59 = vcombine.high %v1603_v54, %v1607_v56  ;;  %v1662_v54 = vld [vmem:[#allocation2 + $0x1f0] sm:$0xff]  ;;  %v1663_v56 = vld [vmem:[#allocation2 + $0x1f8] sm:$0xff] }
 0x4b4   : > { %2417 = vmatprep.subr.bf16.mxu1 %v2737_v60 }
 0x4b7   : > { %2418 = vmatpush1.bf16.msra.mxu1 %v2736_v37  ;;  %v1594_v37 = vpop.permute.xlu0 %1593 }
 0x4b8   : > { %2419 = vmatprep.subr.bf16.mxu1 %v2745_v39 }
 0x4bb   : > { %2420 = vmatpush1.bf16.msra.mxu1 %v2744_v1 }
 0x4bc   : > { %2421 = vmatprep.subr.bf16.mxu1 %v2753_v2 }
 0x4bf   : > { %2422 = vmatpush1.bf16.msra.mxu1 %v2752_v5  ;;  %v1611_v5 = vld [vmem:[#allocation2 + $0x58] sm:$0xff] }
 0x4c0   : > { %2423 = vmatprep.subr.bf16.mxu1 %v2761_v6  ;;  %v1615_v6 = vld [vmem:[#allocation2 + $0x78] sm:$0xff] }
 0x4c3   : > { %2424 = vmatpush1.bf16.msra.mxu1 %v2760_v9  ;;  %v1618_v9 = vld [vmem:[#allocation2 + $0x90] sm:$0xff] }
 0x4c4   : > { %2425 = vmatprep.subr.bf16.mxu1 %v2769_v10  ;;  %v2715_v10 = vcombine.high %v1610_v3, %v1614_v4  ;;  %v2723_v15 = vcombine.high %v1618_v9, %v1622_v11 }
 0x4c7   : > { %2426 = vmatpush1.bf16.msra.mxu1 %v2768_v13  ;;  %v1623_v13 = vld [vmem:[#allocation2 + $0xb8] sm:$0xff] }
 0x4c8   : > { %2427 = vmatprep.subr.bf16.mxu1 %v2777_v14  ;;  %v2716_v14 = vcombine.low %v1611_v5, %v1615_v6  ;;  %v2725_v16 = vcombine.high %v1619_v12, %v1623_v13 }
 0x4cb   : > { %2428 = vmatpush1.bf16.msra.mxu1 %v2776_v17  ;;  %v1626_v17 = vld [vmem:[#allocation2 + $0xd0] sm:$0xff] }
 0x4cc   : > { %2429 = vmatprep.subr.bf16.mxu1 %v2785_v18  ;;  %v1630_v18 = vld [vmem:[#allocation2 + $0xf0] sm:$0xff] }
 0x4cd   : > { %v2731_v22 = vcombine.high %v1626_v17, %v1630_v18 }
 0x4cf   : > { %2430 = vmatpush1.bf16.msra.mxu1 %v2784_v21  ;;  %v2722_v21 = vcombine.low %v1618_v9, %v1622_v11  ;;  %v1682_v11 = vld [vmem:[#allocation2 + $0x290] sm:$0xff] }
 0x4d0   : > { %2431 = vmatprep.subr.bf16.mxu1 %v2793_v0  ;;  %v2724_v0 = vcombine.low %v1619_v12, %v1623_v13  ;;  %v1686_v12 = vld [vmem:[#allocation2 + $0x2b0] sm:$0xff]  ;;  %v1683_v13 = vld [vmem:[#allocation2 + $0x298] sm:$0xff] }
 0x4d3   : > { %2432 = vmatpush1.bf16.msra.mxu1 %v2792_v24  ;;  %v1634_v24 = vld [vmem:[#allocation2 + $0x110] sm:$0xff] }
 0x4d4   : > { %2433 = vmatprep.subr.bf16.mxu1 %v2801_v25  ;;  %v1638_v25 = vld [vmem:[#allocation2 + $0x130] sm:$0xff] }
 0x4d5   : > { %v2738_v40 = vcombine.low %v1634_v24, %v1638_v25 }
 0x4d7   : > { %2434 = vmatpush1.bf16.msra.mxu1 %v2800_v29  ;;  %v2730_v29 = vcombine.low %v1626_v17, %v1630_v18  ;;  %v1690_v18 = vld [vmem:[#allocation2 + $0x2d0] sm:$0xff] }
 0x4d8   : > { %2435 = vmatprep.subr.bf16.mxu1 %v2809_v30  ;;  %v2732_v30 = vcombine.low %v1627_v19, %v1631_v20  ;;  %v1694_v19 = vld [vmem:[#allocation2 + $0x2f0] sm:$0xff]  ;;  %v1691_v20 = vld [vmem:[#allocation2 + $0x2d8] sm:$0xff] }
 0x4db   : > { %2436 = vmatpush1.bf16.msra.mxu1 %v2808_v31  ;;  %v2739_v31 = vcombine.high %v1634_v24, %v1638_v25  ;;  %v1698_v25 = vld [vmem:[#allocation2 + $0x310] sm:$0xff] }
 0x4dc   : > { %2437 = vmatprep.subr.bf16.mxu1 %v2817_v44  ;;  %v2747_v44 = vcombine.high %v1642_v33, %v1646_v35  ;;  %v1706_v35 = vld [vmem:[#allocation2 + $0x350] sm:$0xff] }
 0x4df   : > { %2438 = vmatpush1.bf16.msra.mxu1 %v2816_v41  ;;  %v2740_v41 = vcombine.low %v1635_v26, %v1639_v28  ;;  %v1702_v26 = vld [vmem:[#allocation2 + $0x330] sm:$0xff]  ;;  %v1699_v28 = vld [vmem:[#allocation2 + $0x318] sm:$0xff] }
 0x4e0   : > { %2439 = vmatprep.subr.bf16.mxu1 %v2825_v43  ;;  %v2755_v43 = vcombine.high %v1650_v47, %v1654_v48 }
 0x4e3   : > { %2440 = vmatpush1.bf16.msra.mxu1 %v2824_v52  ;;  %v2748_v52 = vcombine.low %v1643_v27, %v1647_v38  ;;  %v1710_v27 = vld [vmem:[#allocation2 + $0x370] sm:$0xff]  ;;  %v1707_v38 = vld [vmem:[#allocation2 + $0x358] sm:$0xff] }
 0x4e4   : > { %2491 = vmatprep.subr.bf16.mxu1 %v2709_v59  ;;  %v2763_v59 = vcombine.high %v1658_v53, %v1662_v54 }
 0x579   : > { %v1581_v60 = vpop.f32.mrb[20].mxu1 }
 0x57a   : > { %v1588_v61 = vadd.f32 %v1581_v60, %v3352_v34  ;;  %v1583_v62 = vpop.f32.mrb[21].mxu1  ;;  %v2717_v34 = vcombine.high %v1611_v5, %v1615_v6  ;;  %v2765_v60 = vcombine.high %v1659_v55, %v1663_v56  ;;  %v1675_v5 = vld [vmem:[#allocation2 + $0x258] sm:$0xff] }
 0x57b   : > { %v1589_v39 = vadd.f32 %v1583_v62, %v3355_v36  ;;  %v1585_v42 = vpop.f32.mrb[22].mxu1  ;;  %v2714_v36 = vcombine.low %v1610_v3, %v1614_v4  ;;  %v1670_v62 = vld [vmem:[#allocation2 + $0x230] sm:$0xff]  ;;  %v1679_v6 = vld [vmem:[#allocation2 + $0x278] sm:$0xff] }
 0x57c   : > { %v1596_v63 = vadd.f32 %v1594_v37, %v1588_v61  ;;  %v1586_v1 = vpop.f32.mrb[23].mxu1  ;;  %v1666_v61 = vld [vmem:[#allocation2 + $0x210] sm:$0xff]  ;;  %v2762_v42 = vcombine.low %v1658_v53, %v1662_v54 }
 0x57d   : > { %v1597_v2 = vadd.f32 %v1594_v37, %v1589_v39  ;;  %v1667_v37 = vld [vmem:[#allocation2 + $0x218] sm:$0xff]  ;;  %v2771_v1 = vcombine.high %v1666_v61, %v1670_v62  ;;  %v1674_v3 = vld [vmem:[#allocation2 + $0x250] sm:$0xff] }
 0x57e   : > { %v3362_v8 = vpack.c.bf16 %v1596_v63, %v1596_v63  ;;  %v1671_v39 = vld [vmem:[#allocation2 + $0x238] sm:$0xff]  ;;  %v2764_v63 = vcombine.low %v1659_v55, %v1663_v56  ;;  %v1678_v4 = vld [vmem:[#allocation2 + $0x270] sm:$0xff] }
 0x57f   : > { %v1599_v7 = vpack.c.bf16 %v1597_v2, %v1597_v2  ;;  %v2773_v2 = vcombine.high %v1667_v37, %v1671_v39  ;;  %v2772_v9 = vcombine.low %v1667_v37, %v1671_v39  ;;  %v1722_v54 = vld [vmem:[#allocation2 + $0x3d0] sm:$0xff]  ;;  %v1723_v56 = vld [vmem:[#allocation2 + $0x3d8] sm:$0xff] }
 0x580   : > { %v1726_v55 = vld [vmem:[#allocation2 + $0x3f0] sm:$0xff] }
 0x581   : > { %2400 = vmatprep.mubr.bf16.mxu0 %v1599_v7  ;;  %2441 = vmatprep.mubr.bf16.mxu1 %v1599_v7 }
 0x582   : > { %2401 = vmatmul.mubr.bf16.vlgmr.msra.gmra.mrb[24].mxu0 %v3362_v8  ;;  %2442 = vmatmul.mubr.bf16.vlgmr.msra.gmra.mrb[24].mxu1 %v3362_v8 }
 0x583   : > { %2451 = vmatpush1.bf16.msra.mxu0 %v2706_v57  ;;  %2492 = vmatpush1.bf16.msra.mxu1 %v2708_v58  ;;  %v2754_v57 = vcombine.low %v1650_v47, %v1654_v48  ;;  %v2756_v58 = vcombine.low %v1651_v49, %v1655_v50  ;;  %v1714_v48 = vld [vmem:[#allocation2 + $0x390] sm:$0xff]  ;;  %v1715_v50 = vld [vmem:[#allocation2 + $0x398] sm:$0xff] }
 0x584   : > { %2482 = vmatprep.mubr.bf16.mxu0 %v1599_v7  ;;  %2523 = vmatprep.mubr.bf16.mxu1 %v1599_v7  ;;  %v2770_v7 = vcombine.low %v1666_v61, %v1670_v62  ;;  %v1718_v49 = vld [vmem:[#allocation2 + $0x3b0] sm:$0xff]  ;;  %v2826_v62 = vcombine.low %v1722_v54, %v1726_v55 }
 0x585   : > { %2452 = vmatprep.subr.bf16.mxu0 %v2715_v10  ;;  %2493 = vmatprep.subr.bf16.mxu1 %v2717_v34  ;;  %v2779_v10 = vcombine.high %v1674_v3, %v1678_v4  ;;  %v2781_v34 = vcombine.high %v1675_v5, %v1679_v6 }
 0x587   : > { %2453 = vmatpush1.bf16.msra.mxu0 %v2714_v36  ;;  %2494 = vmatpush1.bf16.msra.mxu1 %v2716_v14  ;;  %v1687_v36 = vld [vmem:[#allocation2 + $0x2b8] sm:$0xff]  ;;  %v2778_v14 = vcombine.low %v1674_v3, %v1678_v4 }
 0x588   : > { %2454 = vmatprep.subr.bf16.mxu0 %v2723_v15  ;;  %2495 = vmatprep.subr.bf16.mxu1 %v2725_v16  ;;  %v2780_v15 = vcombine.low %v1675_v5, %v1679_v6  ;;  %v2787_v16 = vcombine.high %v1682_v11, %v1686_v12  ;;  %v2789_v17 = vcombine.high %v1683_v13, %v1687_v36 }
 0x58b   : > { %2455 = vmatpush1.bf16.msra.mxu0 %v2722_v21  ;;  %2496 = vmatpush1.bf16.msra.mxu1 %v2724_v0  ;;  %v1695_v21 = vld [vmem:[#allocation2 + $0x2f8] sm:$0xff]  ;;  %v2786_v0 = vcombine.low %v1682_v11, %v1686_v12 }
 0x58c   : > { %2456 = vmatprep.subr.bf16.mxu0 %v2731_v22  ;;  %2497 = vmatprep.subr.bf16.mxu1 %v2733_v23  ;;  %v2788_v22 = vcombine.low %v1683_v13, %v1687_v36  ;;  %v2795_v23 = vcombine.high %v1690_v18, %v1694_v19  ;;  %v2797_v24 = vcombine.high %v1691_v20, %v1695_v21 }
 0x58f   : > { %2457 = vmatpush1.bf16.msra.mxu0 %v2730_v29  ;;  %2498 = vmatpush1.bf16.msra.mxu1 %v2732_v30  ;;  %v1703_v29 = vld [vmem:[#allocation2 + $0x338] sm:$0xff]  ;;  %v2794_v30 = vcombine.low %v1690_v18, %v1694_v19 }
 0x590   : > { %2458 = vmatprep.subr.bf16.mxu0 %v2739_v31  ;;  %2499 = vmatprep.subr.bf16.mxu1 %v2741_v32  ;;  %v2796_v31 = vcombine.low %v1691_v20, %v1695_v21  ;;  %v2803_v32 = vcombine.high %v1698_v25, %v1702_v26  ;;  %v2805_v33 = vcombine.high %v1699_v28, %v1703_v29 }
 0x593   : > { %2459 = vmatpush1.bf16.msra.mxu0 %v2738_v40  ;;  %2500 = vmatpush1.bf16.msra.mxu1 %v2740_v41  ;;  %v1711_v40 = vld [vmem:[#allocation2 + $0x378] sm:$0xff]  ;;  %v2802_v41 = vcombine.low %v1698_v25, %v1702_v26 }
 0x594   : > { %2460 = vmatprep.subr.bf16.mxu0 %v2747_v44  ;;  %2501 = vmatprep.subr.bf16.mxu1 %v2749_v45  ;;  %v2804_v44 = vcombine.low %v1699_v28, %v1703_v29  ;;  %v2811_v45 = vcombine.high %v1706_v35, %v1710_v27  ;;  %v2813_v47 = vcombine.high %v1707_v38, %v1711_v40 }
 0x597   : > { %2461 = vmatpush1.bf16.msra.mxu0 %v2746_v51  ;;  %2502 = vmatpush1.bf16.msra.mxu1 %v2748_v52  ;;  %v1719_v51 = vld [vmem:[#allocation2 + $0x3b8] sm:$0xff]  ;;  %v2810_v52 = vcombine.low %v1706_v35, %v1710_v27 }
 0x598   : > { %2462 = vmatprep.subr.bf16.mxu0 %v2755_v43  ;;  %2503 = vmatprep.subr.bf16.mxu1 %v2757_v46  ;;  %v2812_v43 = vcombine.low %v1707_v38, %v1711_v40  ;;  %v2819_v46 = vcombine.high %v1714_v48, %v1718_v49  ;;  %v2821_v53 = vcombine.high %v1715_v50, %v1719_v51 }
 0x59b   : > { %2463 = vmatpush1.bf16.msra.mxu0 %v2754_v57  ;;  %2504 = vmatpush1.bf16.msra.mxu1 %v2756_v58  ;;  %v1727_v57 = vld [vmem:[#allocation2 + $0x3f8] sm:$0xff]  ;;  %v2818_v58 = vcombine.low %v1714_v48, %v1718_v49 }
 0x59c   : > { %2464 = vmatprep.subr.bf16.mxu0 %v2763_v59  ;;  %2505 = vmatprep.subr.bf16.mxu1 %v2765_v60  ;;  %v2820_v59 = vcombine.low %v1715_v50, %v1719_v51  ;;  %v2827_v60 = vcombine.high %v1722_v54, %v1726_v55  ;;  %v2829_v61 = vcombine.high %v1723_v56, %v1727_v57 }
 0x59d   : > { %v2828_v37 = vcombine.low %v1723_v56, %v1727_v57 }
 0x59f   : > { %2465 = vmatpush1.bf16.msra.mxu0 %v2762_v42  ;;  %2506 = vmatpush1.bf16.msra.mxu1 %v2764_v63 }
 0x5a0   : > { %2466 = vmatprep.subr.bf16.mxu0 %v2771_v1  ;;  %2507 = vmatprep.subr.bf16.mxu1 %v2773_v2 }
 0x5a3   : > { %2467 = vmatpush1.bf16.msra.mxu0 %v2770_v7  ;;  %2508 = vmatpush1.bf16.msra.mxu1 %v2772_v9 }
 0x5a4   : > { %2468 = vmatprep.subr.bf16.mxu0 %v2779_v10  ;;  %2509 = vmatprep.subr.bf16.mxu1 %v2781_v34 }
 0x5a7   : > { %2469 = vmatpush1.bf16.msra.mxu0 %v2778_v14  ;;  %2510 = vmatpush1.bf16.msra.mxu1 %v2780_v15 }
 0x5a8   : > { %2470 = vmatprep.subr.bf16.mxu0 %v2787_v16  ;;  %2511 = vmatprep.subr.bf16.mxu1 %v2789_v17 }
 0x5ab   : > { %2471 = vmatpush1.bf16.msra.mxu0 %v2786_v0  ;;  %2512 = vmatpush1.bf16.msra.mxu1 %v2788_v22 }
 0x5ac   : > { %2472 = vmatprep.subr.bf16.mxu0 %v2795_v23  ;;  %2513 = vmatprep.subr.bf16.mxu1 %v2797_v24 }
 0x5af   : > { %2473 = vmatpush1.bf16.msra.mxu0 %v2794_v30  ;;  %2514 = vmatpush1.bf16.msra.mxu1 %v2796_v31 }
 0x5b0   : > { %2474 = vmatprep.subr.bf16.mxu0 %v2803_v32  ;;  %2515 = vmatprep.subr.bf16.mxu1 %v2805_v33 }
 0x5b3   : > { %2475 = vmatpush1.bf16.msra.mxu0 %v2802_v41  ;;  %2516 = vmatpush1.bf16.msra.mxu1 %v2804_v44 }
 0x5b4   : > { %2476 = vmatprep.subr.bf16.mxu0 %v2811_v45  ;;  %2517 = vmatprep.subr.bf16.mxu1 %v2813_v47 }
 0x5b7   : > { %2477 = vmatpush1.bf16.msra.mxu0 %v2810_v52  ;;  %2518 = vmatpush1.bf16.msra.mxu1 %v2812_v43 }
 0x5b8   : > { %2478 = vmatprep.subr.bf16.mxu0 %v2819_v46  ;;  %2519 = vmatprep.subr.bf16.mxu1 %v2821_v53 }
 0x5bb   : > { %2479 = vmatpush1.bf16.msra.mxu0 %v2818_v58  ;;  %2520 = vmatpush1.bf16.msra.mxu1 %v2820_v59 }
 0x5bc   : > { %2480 = vmatprep.subr.bf16.mxu0 %v2827_v60  ;;  %2521 = vmatprep.subr.bf16.mxu1 %v2829_v61 }
 0x5bf   : > { %2481 = vmatpush1.bf16.msra.mxu0 %v2826_v62  ;;  %2522 = vmatpush1.bf16.msra.mxu1 %v2828_v37 }
 0x5c2   : > { %2483 = vmatmul.mubr.bf16.vlgmr.msra.gmra.mrb[28].mxu0 %v3362_v8  ;;  %2524 = vmatmul.mubr.bf16.vlgmr.msra.gmra.mrb[28].mxu1 %v3362_v8 }
 0x655   : > { %v2402_v39 = vpop.f32.mrb[24].mxu0  ;;  %v2443_v42 = vpop.f32.mrb[24].mxu1 }
 0x656   : > { %2532 = vst [vmem:[%s731_s5] sm:$0x1f] %v2402_v39  ;;  %2534 = vst [vmem:[%s731_s5 + $0x10] sm:$0x1f] %v2443_v42  ;;  %v2404_v63 = vpop.f32.mrb[25].mxu0  ;;  %v2445_v1 = vpop.f32.mrb[25].mxu1 }
 0x657   : > { %2533 = vst [vmem:[%s731_s5 + $0x8] sm:$0x1f] %v2404_v63  ;;  %2535 = vst [vmem:[%s731_s5 + $0x18] sm:$0x1f] %v2445_v1  ;;  %v2406_v2 = vpop.f32.mrb[26].mxu0  ;;  %v2447_v3 = vpop.f32.mrb[26].mxu1 }
 0x658   : > { %v2407_v4 = vpop.f32.mrb[27].mxu0  ;;  %v2448_v5 = vpop.f32.mrb[27].mxu1 }
 0x695   : > { %v2484_v6 = vpop.f32.mrb[28].mxu0  ;;  %v2525_v7 = vpop.f32.mrb[28].mxu1 }
 0x696   : > { %2536 = vst [vmem:[%s731_s5 + $0x20] sm:$0x1f] %v2484_v6  ;;  %2538 = vst [vmem:[%s731_s5 + $0x30] sm:$0x1f] %v2525_v7  ;;  %v2486_v8 = vpop.f32.mrb[29].mxu0  ;;  %v2527_v9 = vpop.f32.mrb[29].mxu1 }
 0x697   : > { %2537 = vst [vmem:[%s731_s5 + $0x28] sm:$0x1f] %v2486_v8  ;;  %2539 = vst [vmem:[%s731_s5 + $0x38] sm:$0x1f] %v2527_v9  ;;  %v2488_v10 = vpop.f32.mrb[30].mxu0  ;;  %v2529_v34 = vpop.f32.mrb[30].mxu1 }
 0x698   : > { %v2489_v11 = vpop.f32.mrb[31].mxu0  ;;  %v2530_v12 = vpop.f32.mrb[31].mxu1 }
 0x699 PF: > { %s32_s2 = sadd.s32 1, %s2998_s2  }
 0x69a   : > { %p29_p3 = scmp.ge.s32.totalorder %s32_s2, 4  }
 0x69c   :  { %31 = sbr.rel (!%p29_p3) target bundleno = 8 (0x8), region = 148 }
 0x6a3   :  { %2561 = vsyncpa [#allocation3], 1 }
 0x6a4   :  { %2563 = vsyncpa [#allocation3 + $0x1], 1 }

</bundles_post_ra>
